<compile_context>
chip_gen: v5e
topology: v5e:2x2
jax: 0.10.0
libtpu: 0.0.40
codegen_flags: <defaults>
</compile_context>

<pallas_src>
from functools import partial

import jax
import jax.numpy as jnp
from jax.experimental import pallas as pl
from jax.experimental.pallas import tpu as pltpu

H = 128          # hidden size
C = 40           # num classes
C_PAD = 128      # lane-padded classifier width
B_PAD = 8        # sublane-padded batch rows per timestep
D_PAD = 128      # lane-padded input feature width (layer 0)
NUM_LAYERS = 3


# ----------------------------- Fused Pallas kernel ---------------------------

def fused_rnn_classifier_kernel(
        x_ref,        # (T*8, 128)  time-major, batch+feature padded
        wih_ref,      # (3, 128, 128) stacked, pre-transposed input weights
        whh_ref,      # (3, 128, 128) stacked, pre-transposed recurrent weights
        bias_ref,     # (4, 128): rows 0..2 = fused RNN biases, row 3 = fc bias (padded)
        fcw_ref,      # (128, 128) fc weight, pre-transposed + lane-padded
        o_ref,        # (8, 128) output (rows >= B and cols >= 40 are padding)
        h_slab_ref,   # VMEM scratch (T*8, 128) f32
        *, t_steps):

    def run_layer(z, whh, store_outputs):
        """Recurrence h = tanh(Z[t] + h @ W_hh); Z already holds x @ W_ih + b.

        Fully unrolled over the (small, static) time dimension.  W_hh is a
        hoisted value (loaded once per layer).  All per-step slices/stores are
        aligned (8, 128) vreg accesses.
        """
        h = jnp.zeros((B_PAD, H), jnp.float32)
        for t in range(t_steps):
            z_t = z[t * B_PAD:(t + 1) * B_PAD, :]
            h = jnp.tanh(z_t + jnp.dot(h, whh, preferred_element_type=jnp.float32))
            if store_outputs:
                h_slab_ref[t * B_PAD:(t + 1) * B_PAD, :] = h
        return h

    biases = bias_ref[...]                                   # (4, 128), loaded once

    # ---- layer 0: one (T*8,128)@(128,128) bulk projection, then recurrence ----
    z0 = jnp.dot(x_ref[...], wih_ref[0],
                 preferred_element_type=jnp.float32) + biases[0:1, :]
    run_layer(z0, whh_ref[0], store_outputs=True)

    # ---- layer 1 (reads layer-0 slab, then overwrites it with its own) ----
    z1 = jnp.dot(h_slab_ref[...], wih_ref[1],
                 preferred_element_type=jnp.float32) + biases[1:2, :]
    run_layer(z1, whh_ref[1], store_outputs=True)

    # ---- layer 2: only the final hidden state is consumed ----
    z2 = jnp.dot(h_slab_ref[...], wih_ref[2],
                 preferred_element_type=jnp.float32) + biases[2:3, :]
    h_last = run_layer(z2, whh_ref[2], store_outputs=False)

    # ---- classifier: full (8,128) unmasked store; sliced to (B,40) in wrapper ----
    o_ref[...] = jnp.dot(h_last, fcw_ref[...],
                         preferred_element_type=jnp.float32) + biases[3:4, :]


# --------------------- One-time parameter preparation -------------------------

def prepare_params(params):
    """Transpose / fuse / pad / stack weights once, off the steady-state path."""
    wih_list, whh_list, bias_list = [], [], []
    for layer, (w_ih, w_hh, b_ih, b_hh) in enumerate(params["rnn"]):
        w_ih_t = jnp.transpose(w_ih).astype(jnp.float32)            # (D_in, H)
        if layer == 0:                                              # pad K dim 64 -> 128
            w_ih_t = jnp.zeros((D_PAD, H), jnp.float32).at[:w_ih_t.shape[0], :].set(w_ih_t)
        wih_list.append(w_ih_t)                                     # (128, 128)
        whh_list.append(jnp.transpose(w_hh).astype(jnp.float32))    # (128, 128)
        bias_list.append((b_ih + b_hh).astype(jnp.float32))         # (128,) fused bias
    fc_w, fc_b = params["fc"]
    fcw_pad = jnp.zeros((H, C_PAD), jnp.float32).at[:, :C].set(
        jnp.transpose(fc_w).astype(jnp.float32))
    fcb_pad = jnp.zeros((C_PAD,), jnp.float32).at[:C].set(fc_b.astype(jnp.float32))

    wih_all = jnp.stack(wih_list)                    # (3, 128, 128)
    whh_all = jnp.stack(whh_list)                    # (3, 128, 128)
    bias_all = jnp.stack(bias_list + [fcb_pad])      # (4, 128)
    return wih_all, whh_all, bias_all, fcw_pad


# ------------------------------ Python wrapper --------------------------------

@jax.jit
def rnn_classifier_forward(x, prepared):
    """x: (B, T, 64) batch_first, exactly like the PyTorch module."""
    wih_all, whh_all, bias_all, fcw_pad = prepared
    b, t, d = x.shape

    # time-major, batch padded to 8 sublanes, features padded to 128 lanes
    x_tm = jnp.transpose(x, (1, 0, 2)).astype(jnp.float32)            # (T, B, D)
    x_pad = jnp.zeros((t, B_PAD, D_PAD), jnp.float32).at[:, :b, :d].set(x_tm)
    x_pad = x_pad.reshape(t * B_PAD, D_PAD)                           # (T*8, 128)

    vmem = pl.BlockSpec(memory_space=pltpu.MemorySpace.VMEM)
    out_pad = pl.pallas_call(
        partial(fused_rnn_classifier_kernel, t_steps=t),
        out_shape=jax.ShapeDtypeStruct((B_PAD, C_PAD), jnp.float32),
        in_specs=[vmem] * 5,
        out_specs=vmem,
        scratch_shapes=[pltpu.VMEM((t * B_PAD, H), jnp.float32)],
    )(x_pad, wih_all, whh_all, bias_all, fcw_pad)
    return out_pad[:b, :C]                                            # (B, 40)


# ------------------------------ Param init ------------------------------------

def init_params(key, input_size=64, hidden_size=128, num_layers=3, num_classes=40):
    """PyTorch-style uniform(-1/sqrt(H), 1/sqrt(H)) init, deterministic."""
    params = {"rnn": [], "fc": None}
    bound = 1.0 / jnp.sqrt(hidden_size)
    for layer in range(num_layers):
        d_in = input_size if layer == 0 else hidden_size
        key, k1, k2, k3, k4 = jax.random.split(key, 5)
        w_ih = jax.random.uniform(k1, (hidden_size, d_in), jnp.float32, -bound, bound)
        w_hh = jax.random.uniform(k2, (hidden_size, hidden_size), jnp.float32, -bound, bound)
        b_ih = jax.random.uniform(k3, (hidden_size,), jnp.float32, -bound, bound)
        b_hh = jax.random.uniform(k4, (hidden_size,), jnp.float32, -bound, bound)
        params["rnn"].append((w_ih, w_hh, b_ih, b_hh))
    key, k1, k2 = jax.random.split(key, 3)
    fc_bound = 1.0 / jnp.sqrt(hidden_size)
    fc_w = jax.random.uniform(k1, (num_classes, hidden_size), jnp.float32, -fc_bound, fc_bound)
    fc_b = jax.random.uniform(k2, (num_classes,), jnp.float32, -fc_bound, fc_bound)
    params["fc"] = (fc_w, fc_b)
    return params


# ------------------------------ Reference (pure JAX) --------------------------

def rnn_classifier_reference(x, params):
    h_seq = x.astype(jnp.float32)                          # (B, T, D)
    B, T, _ = h_seq.shape
    Hd = params["rnn"][0][1].shape[0]
    for (w_ih, w_hh, b_ih, b_hh) in params["rnn"]:
        h = jnp.zeros((B, Hd), jnp.float32)
        outs = []
        for t in range(T):
            h = jnp.tanh(h_seq[:, t, :] @ w_ih.T + b_ih + h @ w_hh.T + b_hh)
            outs.append(h)
        h_seq = jnp.stack(outs, axis=1)                    # (B, T, H)
    fc_w, fc_b = params["fc"]
    return h_seq[:, -1, :] @ fc_w.T + fc_b


# ----------------------------------- Main --------------------------------------

if __name__ == "__main__":
    key = jax.random.PRNGKey(0)
    k_param, k_x = jax.random.split(key)

    B, T, D_IN = 2, 8, 64
    params = init_params(k_param)
    prepared = jax.block_until_ready(prepare_params(params))   # one-time prep
    x = jax.random.normal(k_x, (B, T, D_IN), dtype=jnp.float32)

    out = rnn_classifier_forward(x, prepared)
    out = jax.block_until_ready(out)

    ref = rnn_classifier_reference(x, params)
    assert out.shape == (B, 40), out.shape
    assert jnp.allclose(out, ref, atol=1e-4, rtol=1e-4), "mismatch vs reference"

    print("KERNEL_OK")
</pallas_src>

<mosaic_0001>
module attributes {stable_mosaic.version = 11 : i64} {
  func.func @fused_rnn_classifier_kernel(%arg0: memref<64x128xf32, #tpu.memory_space<vmem>>, %arg1: memref<3x128x128xf32, #tpu.memory_space<vmem>>, %arg2: memref<3x128x128xf32, #tpu.memory_space<vmem>>, %arg3: memref<4x128xf32, #tpu.memory_space<vmem>>, %arg4: memref<128x128xf32, #tpu.memory_space<vmem>>, %arg5: memref<8x128xf32, #tpu.memory_space<vmem>>, %arg6: memref<64x128xf32, #tpu.memory_space<vmem>>) attributes {dimension_semantics = [], scalar_prefetch = 0 : i64, scratch_operands = 1 : i64, tpu.core_type = #tpu.core_type<tc>} {
    %c0 = arith.constant 0 : index
    %c0_0 = arith.constant 0 : index
    %0 = vector.load %arg3[%c0, %c0_0] : memref<4x128xf32, #tpu.memory_space<vmem>>, vector<4x128xf32>
    %c0_1 = arith.constant 0 : index
    %c0_2 = arith.constant 0 : index
    %1 = vector.load %arg0[%c0_1, %c0_2] : memref<64x128xf32, #tpu.memory_space<vmem>>, vector<64x128xf32>
    %c0_3 = arith.constant 0 : index
    %c0_4 = arith.constant 0 : index
    %c0_5 = arith.constant 0 : index
    %2 = vector.load %arg1[%c0_3, %c0_4, %c0_5] : memref<3x128x128xf32, #tpu.memory_space<vmem>>, vector<1x128x128xf32>
    %3 = vector.shape_cast %2 : vector<1x128x128xf32> to vector<128x128xf32>
    %cst = arith.constant dense<0.000000e+00> : vector<64x128xf32>
    %4 = tpu.matmul %1, %3, %cst {dimension_numbers = #tpu.dot_dimension_numbers<[1], [0], [0], [1], [0, 0, 1, 1], [], []>} : vector<64x128xf32>, vector<128x128xf32>, vector<64x128xf32> -> vector<64x128xf32>
    %5 = vector.extract_strided_slice %0 {offsets = [0, 0], sizes = [1, 128], strides = [1, 1]} : vector<4x128xf32> to vector<1x128xf32>
    %6 = vector.broadcast %5 : vector<1x128xf32> to vector<64x128xf32>
    %7 = arith.addf %4, %6 : vector<64x128xf32>
    %c0_6 = arith.constant 0 : index
    %c0_7 = arith.constant 0 : index
    %c0_8 = arith.constant 0 : index
    %8 = vector.load %arg2[%c0_6, %c0_7, %c0_8] : memref<3x128x128xf32, #tpu.memory_space<vmem>>, vector<1x128x128xf32>
    %9 = vector.shape_cast %8 : vector<1x128x128xf32> to vector<128x128xf32>
    %cst_9 = arith.constant 0.000000e+00 : f32
    %10 = vector.broadcast %cst_9 : f32 to vector<8x128xf32>
    %11 = vector.extract_strided_slice %7 {offsets = [0, 0], sizes = [8, 128], strides = [1, 1]} : vector<64x128xf32> to vector<8x128xf32>
    %cst_10 = arith.constant dense<0.000000e+00> : vector<8x128xf32>
    %12 = tpu.matmul %10, %9, %cst_10 {dimension_numbers = #tpu.dot_dimension_numbers<[1], [0], [0], [1], [0, 0, 1, 1], [], []>} : vector<8x128xf32>, vector<128x128xf32>, vector<8x128xf32> -> vector<8x128xf32>
    %13 = arith.addf %11, %12 : vector<8x128xf32>
    %14 = math.tanh %13 : vector<8x128xf32>
    %c0_11 = arith.constant 0 : index
    %c0_12 = arith.constant 0 : index
    %15 = vector.load %arg6[%c0_11, %c0_12] : memref<64x128xf32, #tpu.memory_space<vmem>>, vector<8x128xf32>
    tpu.vector_store %arg6[%c0_11, %c0_12], %14 {strides = array<i32>} : memref<64x128xf32, #tpu.memory_space<vmem>>, vector<8x128xf32>,
    %16 = vector.extract_strided_slice %7 {offsets = [8, 0], sizes = [8, 128], strides = [1, 1]} : vector<64x128xf32> to vector<8x128xf32>
    %cst_13 = arith.constant dense<0.000000e+00> : vector<8x128xf32>
    %17 = tpu.matmul %14, %9, %cst_13 {dimension_numbers = #tpu.dot_dimension_numbers<[1], [0], [0], [1], [0, 0, 1, 1], [], []>} : vector<8x128xf32>, vector<128x128xf32>, vector<8x128xf32> -> vector<8x128xf32>
    %18 = arith.addf %16, %17 : vector<8x128xf32>
    %19 = math.tanh %18 : vector<8x128xf32>
    %c8 = arith.constant 8 : index
    %c0_14 = arith.constant 0 : index
    %20 = vector.load %arg6[%c8, %c0_14] : memref<64x128xf32, #tpu.memory_space<vmem>>, vector<8x128xf32>
    tpu.vector_store %arg6[%c8, %c0_14], %19 {strides = array<i32>} : memref<64x128xf32, #tpu.memory_space<vmem>>, vector<8x128xf32>,
    %21 = vector.extract_strided_slice %7 {offsets = [16, 0], sizes = [8, 128], strides = [1, 1]} : vector<64x128xf32> to vector<8x128xf32>
    %cst_15 = arith.constant dense<0.000000e+00> : vector<8x128xf32>
    %22 = tpu.matmul %19, %9, %cst_15 {dimension_numbers = #tpu.dot_dimension_numbers<[1], [0], [0], [1], [0, 0, 1, 1], [], []>} : vector<8x128xf32>, vector<128x128xf32>, vector<8x128xf32> -> vector<8x128xf32>
    %23 = arith.addf %21, %22 : vector<8x128xf32>
    %24 = math.tanh %23 : vector<8x128xf32>
    %c16 = arith.constant 16 : index
    %c0_16 = arith.constant 0 : index
    %25 = vector.load %arg6[%c16, %c0_16] : memref<64x128xf32, #tpu.memory_space<vmem>>, vector<8x128xf32>
    tpu.vector_store %arg6[%c16, %c0_16], %24 {strides = array<i32>} : memref<64x128xf32, #tpu.memory_space<vmem>>, vector<8x128xf32>,
    %26 = vector.extract_strided_slice %7 {offsets = [24, 0], sizes = [8, 128], strides = [1, 1]} : vector<64x128xf32> to vector<8x128xf32>
    %cst_17 = arith.constant dense<0.000000e+00> : vector<8x128xf32>
    %27 = tpu.matmul %24, %9, %cst_17 {dimension_numbers = #tpu.dot_dimension_numbers<[1], [0], [0], [1], [0, 0, 1, 1], [], []>} : vector<8x128xf32>, vector<128x128xf32>, vector<8x128xf32> -> vector<8x128xf32>
    %28 = arith.addf %26, %27 : vector<8x128xf32>
    %29 = math.tanh %28 : vector<8x128xf32>
    %c24 = arith.constant 24 : index
    %c0_18 = arith.constant 0 : index
    %30 = vector.load %arg6[%c24, %c0_18] : memref<64x128xf32, #tpu.memory_space<vmem>>, vector<8x128xf32>
    tpu.vector_store %arg6[%c24, %c0_18], %29 {strides = array<i32>} : memref<64x128xf32, #tpu.memory_space<vmem>>, vector<8x128xf32>,
    %31 = vector.extract_strided_slice %7 {offsets = [32, 0], sizes = [8, 128], strides = [1, 1]} : vector<64x128xf32> to vector<8x128xf32>
    %cst_19 = arith.constant dense<0.000000e+00> : vector<8x128xf32>
    %32 = tpu.matmul %29, %9, %cst_19 {dimension_numbers = #tpu.dot_dimension_numbers<[1], [0], [0], [1], [0, 0, 1, 1], [], []>} : vector<8x128xf32>, vector<128x128xf32>, vector<8x128xf32> -> vector<8x128xf32>
    %33 = arith.addf %31, %32 : vector<8x128xf32>
    %34 = math.tanh %33 : vector<8x128xf32>
    %c32 = arith.constant 32 : index
    %c0_20 = arith.constant 0 : index
    %35 = vector.load %arg6[%c32, %c0_20] : memref<64x128xf32, #tpu.memory_space<vmem>>, vector<8x128xf32>
    tpu.vector_store %arg6[%c32, %c0_20], %34 {strides = array<i32>} : memref<64x128xf32, #tpu.memory_space<vmem>>, vector<8x128xf32>,
    %36 = vector.extract_strided_slice %7 {offsets = [40, 0], sizes = [8, 128], strides = [1, 1]} : vector<64x128xf32> to vector<8x128xf32>
    %cst_21 = arith.constant dense<0.000000e+00> : vector<8x128xf32>
    %37 = tpu.matmul %34, %9, %cst_21 {dimension_numbers = #tpu.dot_dimension_numbers<[1], [0], [0], [1], [0, 0, 1, 1], [], []>} : vector<8x128xf32>, vector<128x128xf32>, vector<8x128xf32> -> vector<8x128xf32>
    %38 = arith.addf %36, %37 : vector<8x128xf32>
    %39 = math.tanh %38 : vector<8x128xf32>
    %c40 = arith.constant 40 : index
    %c0_22 = arith.constant 0 : index
    %40 = vector.load %arg6[%c40, %c0_22] : memref<64x128xf32, #tpu.memory_space<vmem>>, vector<8x128xf32>
    tpu.vector_store %arg6[%c40, %c0_22], %39 {strides = array<i32>} : memref<64x128xf32, #tpu.memory_space<vmem>>, vector<8x128xf32>,
    %41 = vector.extract_strided_slice %7 {offsets = [48, 0], sizes = [8, 128], strides = [1, 1]} : vector<64x128xf32> to vector<8x128xf32>
    %cst_23 = arith.constant dense<0.000000e+00> : vector<8x128xf32>
    %42 = tpu.matmul %39, %9, %cst_23 {dimension_numbers = #tpu.dot_dimension_numbers<[1], [0], [0], [1], [0, 0, 1, 1], [], []>} : vector<8x128xf32>, vector<128x128xf32>, vector<8x128xf32> -> vector<8x128xf32>
    %43 = arith.addf %41, %42 : vector<8x128xf32>
    %44 = math.tanh %43 : vector<8x128xf32>
    %c48 = arith.constant 48 : index
    %c0_24 = arith.constant 0 : index
    %45 = vector.load %arg6[%c48, %c0_24] : memref<64x128xf32, #tpu.memory_space<vmem>>, vector<8x128xf32>
    tpu.vector_store %arg6[%c48, %c0_24], %44 {strides = array<i32>} : memref<64x128xf32, #tpu.memory_space<vmem>>, vector<8x128xf32>,
    %46 = vector.extract_strided_slice %7 {offsets = [56, 0], sizes = [8, 128], strides = [1, 1]} : vector<64x128xf32> to vector<8x128xf32>
    %cst_25 = arith.constant dense<0.000000e+00> : vector<8x128xf32>
    %47 = tpu.matmul %44, %9, %cst_25 {dimension_numbers = #tpu.dot_dimension_numbers<[1], [0], [0], [1], [0, 0, 1, 1], [], []>} : vector<8x128xf32>, vector<128x128xf32>, vector<8x128xf32> -> vector<8x128xf32>
    %48 = arith.addf %46, %47 : vector<8x128xf32>
    %49 = math.tanh %48 : vector<8x128xf32>
    %c56 = arith.constant 56 : index
    %c0_26 = arith.constant 0 : index
    %50 = vector.load %arg6[%c56, %c0_26] : memref<64x128xf32, #tpu.memory_space<vmem>>, vector<8x128xf32>
    tpu.vector_store %arg6[%c56, %c0_26], %49 {strides = array<i32>} : memref<64x128xf32, #tpu.memory_space<vmem>>, vector<8x128xf32>,
    %c0_27 = arith.constant 0 : index
    %c0_28 = arith.constant 0 : index
    %51 = vector.load %arg6[%c0_27, %c0_28] : memref<64x128xf32, #tpu.memory_space<vmem>>, vector<64x128xf32>
    %c1 = arith.constant 1 : index
    %c0_29 = arith.constant 0 : index
    %c0_30 = arith.constant 0 : index
    %52 = vector.load %arg1[%c1, %c0_29, %c0_30] : memref<3x128x128xf32, #tpu.memory_space<vmem>>, vector<1x128x128xf32>
    %53 = vector.shape_cast %52 : vector<1x128x128xf32> to vector<128x128xf32>
    %cst_31 = arith.constant dense<0.000000e+00> : vector<64x128xf32>
    %54 = tpu.matmul %51, %53, %cst_31 {dimension_numbers = #tpu.dot_dimension_numbers<[1], [0], [0], [1], [0, 0, 1, 1], [], []>} : vector<64x128xf32>, vector<128x128xf32>, vector<64x128xf32> -> vector<64x128xf32>
    %55 = vector.extract_strided_slice %0 {offsets = [1, 0], sizes = [1, 128], strides = [1, 1]} : vector<4x128xf32> to vector<1x128xf32>
    %56 = vector.broadcast %55 : vector<1x128xf32> to vector<64x128xf32>
    %57 = arith.addf %54, %56 : vector<64x128xf32>
    %c1_32 = arith.constant 1 : index
    %c0_33 = arith.constant 0 : index
    %c0_34 = arith.constant 0 : index
    %58 = vector.load %arg2[%c1_32, %c0_33, %c0_34] : memref<3x128x128xf32, #tpu.memory_space<vmem>>, vector<1x128x128xf32>
    %59 = vector.shape_cast %58 : vector<1x128x128xf32> to vector<128x128xf32>
    %cst_35 = arith.constant 0.000000e+00 : f32
    %60 = vector.broadcast %cst_35 : f32 to vector<8x128xf32>
    %61 = vector.extract_strided_slice %57 {offsets = [0, 0], sizes = [8, 128], strides = [1, 1]} : vector<64x128xf32> to vector<8x128xf32>
    %cst_36 = arith.constant dense<0.000000e+00> : vector<8x128xf32>
    %62 = tpu.matmul %60, %59, %cst_36 {dimension_numbers = #tpu.dot_dimension_numbers<[1], [0], [0], [1], [0, 0, 1, 1], [], []>} : vector<8x128xf32>, vector<128x128xf32>, vector<8x128xf32> -> vector<8x128xf32>
    %63 = arith.addf %61, %62 : vector<8x128xf32>
    %64 = math.tanh %63 : vector<8x128xf32>
    %c0_37 = arith.constant 0 : index
    %c0_38 = arith.constant 0 : index
    %65 = vector.load %arg6[%c0_37, %c0_38] : memref<64x128xf32, #tpu.memory_space<vmem>>, vector<8x128xf32>
    tpu.vector_store %arg6[%c0_37, %c0_38], %64 {strides = array<i32>} : memref<64x128xf32, #tpu.memory_space<vmem>>, vector<8x128xf32>,
    %66 = vector.extract_strided_slice %57 {offsets = [8, 0], sizes = [8, 128], strides = [1, 1]} : vector<64x128xf32> to vector<8x128xf32>
    %cst_39 = arith.constant dense<0.000000e+00> : vector<8x128xf32>
    %67 = tpu.matmul %64, %59, %cst_39 {dimension_numbers = #tpu.dot_dimension_numbers<[1], [0], [0], [1], [0, 0, 1, 1], [], []>} : vector<8x128xf32>, vector<128x128xf32>, vector<8x128xf32> -> vector<8x128xf32>
    %68 = arith.addf %66, %67 : vector<8x128xf32>
    %69 = math.tanh %68 : vector<8x128xf32>
    %c8_40 = arith.constant 8 : index
    %c0_41 = arith.constant 0 : index
    %70 = vector.load %arg6[%c8_40, %c0_41] : memref<64x128xf32, #tpu.memory_space<vmem>>, vector<8x128xf32>
    tpu.vector_store %arg6[%c8_40, %c0_41], %69 {strides = array<i32>} : memref<64x128xf32, #tpu.memory_space<vmem>>, vector<8x128xf32>,
    %71 = vector.extract_strided_slice %57 {offsets = [16, 0], sizes = [8, 128], strides = [1, 1]} : vector<64x128xf32> to vector<8x128xf32>
    %cst_42 = arith.constant dense<0.000000e+00> : vector<8x128xf32>
    %72 = tpu.matmul %69, %59, %cst_42 {dimension_numbers = #tpu.dot_dimension_numbers<[1], [0], [0], [1], [0, 0, 1, 1], [], []>} : vector<8x128xf32>, vector<128x128xf32>, vector<8x128xf32> -> vector<8x128xf32>
    %73 = arith.addf %71, %72 : vector<8x128xf32>
    %74 = math.tanh %73 : vector<8x128xf32>
    %c16_43 = arith.constant 16 : index
    %c0_44 = arith.constant 0 : index
    %75 = vector.load %arg6[%c16_43, %c0_44] : memref<64x128xf32, #tpu.memory_space<vmem>>, vector<8x128xf32>
    tpu.vector_store %arg6[%c16_43, %c0_44], %74 {strides = array<i32>} : memref<64x128xf32, #tpu.memory_space<vmem>>, vector<8x128xf32>,
    %76 = vector.extract_strided_slice %57 {offsets = [24, 0], sizes = [8, 128], strides = [1, 1]} : vector<64x128xf32> to vector<8x128xf32>
    %cst_45 = arith.constant dense<0.000000e+00> : vector<8x128xf32>
    %77 = tpu.matmul %74, %59, %cst_45 {dimension_numbers = #tpu.dot_dimension_numbers<[1], [0], [0], [1], [0, 0, 1, 1], [], []>} : vector<8x128xf32>, vector<128x128xf32>, vector<8x128xf32> -> vector<8x128xf32>
    %78 = arith.addf %76, %77 : vector<8x128xf32>
    %79 = math.tanh %78 : vector<8x128xf32>
    %c24_46 = arith.constant 24 : index
    %c0_47 = arith.constant 0 : index
    %80 = vector.load %arg6[%c24_46, %c0_47] : memref<64x128xf32, #tpu.memory_space<vmem>>, vector<8x128xf32>
    tpu.vector_store %arg6[%c24_46, %c0_47], %79 {strides = array<i32>} : memref<64x128xf32, #tpu.memory_space<vmem>>, vector<8x128xf32>,
    %81 = vector.extract_strided_slice %57 {offsets = [32, 0], sizes = [8, 128], strides = [1, 1]} : vector<64x128xf32> to vector<8x128xf32>
    %cst_48 = arith.constant dense<0.000000e+00> : vector<8x128xf32>
    %82 = tpu.matmul %79, %59, %cst_48 {dimension_numbers = #tpu.dot_dimension_numbers<[1], [0], [0], [1], [0, 0, 1, 1], [], []>} : vector<8x128xf32>, vector<128x128xf32>, vector<8x128xf32> -> vector<8x128xf32>
    %83 = arith.addf %81, %82 : vector<8x128xf32>
    %84 = math.tanh %83 : vector<8x128xf32>
    %c32_49 = arith.constant 32 : index
    %c0_50 = arith.constant 0 : index
    %85 = vector.load %arg6[%c32_49, %c0_50] : memref<64x128xf32, #tpu.memory_space<vmem>>, vector<8x128xf32>
    tpu.vector_store %arg6[%c32_49, %c0_50], %84 {strides = array<i32>} : memref<64x128xf32, #tpu.memory_space<vmem>>, vector<8x128xf32>,
    %86 = vector.extract_strided_slice %57 {offsets = [40, 0], sizes = [8, 128], strides = [1, 1]} : vector<64x128xf32> to vector<8x128xf32>
    %cst_51 = arith.constant dense<0.000000e+00> : vector<8x128xf32>
    %87 = tpu.matmul %84, %59, %cst_51 {dimension_numbers = #tpu.dot_dimension_numbers<[1], [0], [0], [1], [0, 0, 1, 1], [], []>} : vector<8x128xf32>, vector<128x128xf32>, vector<8x128xf32> -> vector<8x128xf32>
    %88 = arith.addf %86, %87 : vector<8x128xf32>
    %89 = math.tanh %88 : vector<8x128xf32>
    %c40_52 = arith.constant 40 : index
    %c0_53 = arith.constant 0 : index
    %90 = vector.load %arg6[%c40_52, %c0_53] : memref<64x128xf32, #tpu.memory_space<vmem>>, vector<8x128xf32>
    tpu.vector_store %arg6[%c40_52, %c0_53], %89 {strides = array<i32>} : memref<64x128xf32, #tpu.memory_space<vmem>>, vector<8x128xf32>,
    %91 = vector.extract_strided_slice %57 {offsets = [48, 0], sizes = [8, 128], strides = [1, 1]} : vector<64x128xf32> to vector<8x128xf32>
    %cst_54 = arith.constant dense<0.000000e+00> : vector<8x128xf32>
    %92 = tpu.matmul %89, %59, %cst_54 {dimension_numbers = #tpu.dot_dimension_numbers<[1], [0], [0], [1], [0, 0, 1, 1], [], []>} : vector<8x128xf32>, vector<128x128xf32>, vector<8x128xf32> -> vector<8x128xf32>
    %93 = arith.addf %91, %92 : vector<8x128xf32>
    %94 = math.tanh %93 : vector<8x128xf32>
    %c48_55 = arith.constant 48 : index
    %c0_56 = arith.constant 0 : index
    %95 = vector.load %arg6[%c48_55, %c0_56] : memref<64x128xf32, #tpu.memory_space<vmem>>, vector<8x128xf32>
    tpu.vector_store %arg6[%c48_55, %c0_56], %94 {strides = array<i32>} : memref<64x128xf32, #tpu.memory_space<vmem>>, vector<8x128xf32>,
    %96 = vector.extract_strided_slice %57 {offsets = [56, 0], sizes = [8, 128], strides = [1, 1]} : vector<64x128xf32> to vector<8x128xf32>
    %cst_57 = arith.constant dense<0.000000e+00> : vector<8x128xf32>
    %97 = tpu.matmul %94, %59, %cst_57 {dimension_numbers = #tpu.dot_dimension_numbers<[1], [0], [0], [1], [0, 0, 1, 1], [], []>} : vector<8x128xf32>, vector<128x128xf32>, vector<8x128xf32> -> vector<8x128xf32>
    %98 = arith.addf %96, %97 : vector<8x128xf32>
    %99 = math.tanh %98 : vector<8x128xf32>
    %c56_58 = arith.constant 56 : index
    %c0_59 = arith.constant 0 : index
    %100 = vector.load %arg6[%c56_58, %c0_59] : memref<64x128xf32, #tpu.memory_space<vmem>>, vector<8x128xf32>
    tpu.vector_store %arg6[%c56_58, %c0_59], %99 {strides = array<i32>} : memref<64x128xf32, #tpu.memory_space<vmem>>, vector<8x128xf32>,
    %c0_60 = arith.constant 0 : index
    %c0_61 = arith.constant 0 : index
    %101 = vector.load %arg6[%c0_60, %c0_61] : memref<64x128xf32, #tpu.memory_space<vmem>>, vector<64x128xf32>
    %c2 = arith.constant 2 : index
    %c0_62 = arith.constant 0 : index
    %c0_63 = arith.constant 0 : index
    %102 = vector.load %arg1[%c2, %c0_62, %c0_63] : memref<3x128x128xf32, #tpu.memory_space<vmem>>, vector<1x128x128xf32>
    %103 = vector.shape_cast %102 : vector<1x128x128xf32> to vector<128x128xf32>
    %cst_64 = arith.constant dense<0.000000e+00> : vector<64x128xf32>
    %104 = tpu.matmul %101, %103, %cst_64 {dimension_numbers = #tpu.dot_dimension_numbers<[1], [0], [0], [1], [0, 0, 1, 1], [], []>} : vector<64x128xf32>, vector<128x128xf32>, vector<64x128xf32> -> vector<64x128xf32>
    %105 = vector.extract_strided_slice %0 {offsets = [2, 0], sizes = [1, 128], strides = [1, 1]} : vector<4x128xf32> to vector<1x128xf32>
    %106 = vector.broadcast %105 : vector<1x128xf32> to vector<64x128xf32>
    %107 = arith.addf %104, %106 : vector<64x128xf32>
    %c2_65 = arith.constant 2 : index
    %c0_66 = arith.constant 0 : index
    %c0_67 = arith.constant 0 : index
    %108 = vector.load %arg2[%c2_65, %c0_66, %c0_67] : memref<3x128x128xf32, #tpu.memory_space<vmem>>, vector<1x128x128xf32>
    %109 = vector.shape_cast %108 : vector<1x128x128xf32> to vector<128x128xf32>
    %cst_68 = arith.constant 0.000000e+00 : f32
    %110 = vector.broadcast %cst_68 : f32 to vector<8x128xf32>
    %111 = vector.extract_strided_slice %107 {offsets = [0, 0], sizes = [8, 128], strides = [1, 1]} : vector<64x128xf32> to vector<8x128xf32>
    %cst_69 = arith.constant dense<0.000000e+00> : vector<8x128xf32>
    %112 = tpu.matmul %110, %109, %cst_69 {dimension_numbers = #tpu.dot_dimension_numbers<[1], [0], [0], [1], [0, 0, 1, 1], [], []>} : vector<8x128xf32>, vector<128x128xf32>, vector<8x128xf32> -> vector<8x128xf32>
    %113 = arith.addf %111, %112 : vector<8x128xf32>
    %114 = math.tanh %113 : vector<8x128xf32>
    %115 = vector.extract_strided_slice %107 {offsets = [8, 0], sizes = [8, 128], strides = [1, 1]} : vector<64x128xf32> to vector<8x128xf32>
    %cst_70 = arith.constant dense<0.000000e+00> : vector<8x128xf32>
    %116 = tpu.matmul %114, %109, %cst_70 {dimension_numbers = #tpu.dot_dimension_numbers<[1], [0], [0], [1], [0, 0, 1, 1], [], []>} : vector<8x128xf32>, vector<128x128xf32>, vector<8x128xf32> -> vector<8x128xf32>
    %117 = arith.addf %115, %116 : vector<8x128xf32>
    %118 = math.tanh %117 : vector<8x128xf32>
    %119 = vector.extract_strided_slice %107 {offsets = [16, 0], sizes = [8, 128], strides = [1, 1]} : vector<64x128xf32> to vector<8x128xf32>
    %cst_71 = arith.constant dense<0.000000e+00> : vector<8x128xf32>
    %120 = tpu.matmul %118, %109, %cst_71 {dimension_numbers = #tpu.dot_dimension_numbers<[1], [0], [0], [1], [0, 0, 1, 1], [], []>} : vector<8x128xf32>, vector<128x128xf32>, vector<8x128xf32> -> vector<8x128xf32>
    %121 = arith.addf %119, %120 : vector<8x128xf32>
    %122 = math.tanh %121 : vector<8x128xf32>
    %123 = vector.extract_strided_slice %107 {offsets = [24, 0], sizes = [8, 128], strides = [1, 1]} : vector<64x128xf32> to vector<8x128xf32>
    %cst_72 = arith.constant dense<0.000000e+00> : vector<8x128xf32>
    %124 = tpu.matmul %122, %109, %cst_72 {dimension_numbers = #tpu.dot_dimension_numbers<[1], [0], [0], [1], [0, 0, 1, 1], [], []>} : vector<8x128xf32>, vector<128x128xf32>, vector<8x128xf32> -> vector<8x128xf32>
    %125 = arith.addf %123, %124 : vector<8x128xf32>
    %126 = math.tanh %125 : vector<8x128xf32>
    %127 = vector.extract_strided_slice %107 {offsets = [32, 0], sizes = [8, 128], strides = [1, 1]} : vector<64x128xf32> to vector<8x128xf32>
    %cst_73 = arith.constant dense<0.000000e+00> : vector<8x128xf32>
    %128 = tpu.matmul %126, %109, %cst_73 {dimension_numbers = #tpu.dot_dimension_numbers<[1], [0], [0], [1], [0, 0, 1, 1], [], []>} : vector<8x128xf32>, vector<128x128xf32>, vector<8x128xf32> -> vector<8x128xf32>
    %129 = arith.addf %127, %128 : vector<8x128xf32>
    %130 = math.tanh %129 : vector<8x128xf32>
    %131 = vector.extract_strided_slice %107 {offsets = [40, 0], sizes = [8, 128], strides = [1, 1]} : vector<64x128xf32> to vector<8x128xf32>
    %cst_74 = arith.constant dense<0.000000e+00> : vector<8x128xf32>
    %132 = tpu.matmul %130, %109, %cst_74 {dimension_numbers = #tpu.dot_dimension_numbers<[1], [0], [0], [1], [0, 0, 1, 1], [], []>} : vector<8x128xf32>, vector<128x128xf32>, vector<8x128xf32> -> vector<8x128xf32>
    %133 = arith.addf %131, %132 : vector<8x128xf32>
    %134 = math.tanh %133 : vector<8x128xf32>
    %135 = vector.extract_strided_slice %107 {offsets = [48, 0], sizes = [8, 128], strides = [1, 1]} : vector<64x128xf32> to vector<8x128xf32>
    %cst_75 = arith.constant dense<0.000000e+00> : vector<8x128xf32>
    %136 = tpu.matmul %134, %109, %cst_75 {dimension_numbers = #tpu.dot_dimension_numbers<[1], [0], [0], [1], [0, 0, 1, 1], [], []>} : vector<8x128xf32>, vector<128x128xf32>, vector<8x128xf32> -> vector<8x128xf32>
    %137 = arith.addf %135, %136 : vector<8x128xf32>
    %138 = math.tanh %137 : vector<8x128xf32>
    %139 = vector.extract_strided_slice %107 {offsets = [56, 0], sizes = [8, 128], strides = [1, 1]} : vector<64x128xf32> to vector<8x128xf32>
    %cst_76 = arith.constant dense<0.000000e+00> : vector<8x128xf32>
    %140 = tpu.matmul %138, %109, %cst_76 {dimension_numbers = #tpu.dot_dimension_numbers<[1], [0], [0], [1], [0, 0, 1, 1], [], []>} : vector<8x128xf32>, vector<128x128xf32>, vector<8x128xf32> -> vector<8x128xf32>
    %141 = arith.addf %139, %140 : vector<8x128xf32>
    %142 = math.tanh %141 : vector<8x128xf32>
    %c0_77 = arith.constant 0 : index
    %c0_78 = arith.constant 0 : index
    %143 = vector.load %arg4[%c0_77, %c0_78] : memref<128x128xf32, #tpu.memory_space<vmem>>, vector<128x128xf32>
    %cst_79 = arith.constant dense<0.000000e+00> : vector<8x128xf32>
    %144 = tpu.matmul %142, %143, %cst_79 {dimension_numbers = #tpu.dot_dimension_numbers<[1], [0], [0], [1], [0, 0, 1, 1], [], []>} : vector<8x128xf32>, vector<128x128xf32>, vector<8x128xf32> -> vector<8x128xf32>
    %145 = vector.extract_strided_slice %0 {offsets = [3, 0], sizes = [1, 128], strides = [1, 1]} : vector<4x128xf32> to vector<1x128xf32>
    %146 = vector.broadcast %145 : vector<1x128xf32> to vector<8x128xf32>
    %147 = arith.addf %144, %146 : vector<8x128xf32>
    %c0_80 = arith.constant 0 : index
    %c0_81 = arith.constant 0 : index
    %148 = vector.load %arg5[%c0_80, %c0_81] : memref<8x128xf32, #tpu.memory_space<vmem>>, vector<8x128xf32>
    tpu.vector_store %arg5[%c0_80, %c0_81], %147 {strides = array<i32>} : memref<8x128xf32, #tpu.memory_space<vmem>>, vector<8x128xf32>,
    return
  }
}

</mosaic_0001>

<bundles_post_ra>
// kernel: rnn_classifier_forward.1
= control target key start
LH: loop header
LB: loop body
LE: loop exit
PB: predicated region body
PF: predicated region fallthrough
CT: control target
= control target key end

     0   :  { %10 = vsyncpa [#allocation4], 0  ;;  %s1653_s0 = inlined_call_operand.vmem [shape: f32[64,128], index: 0, kind: input, shape index: {}]   ;;  %s1654_s1 = inlined_call_operand.hbm [shape: f32[3,128,128], index: 1, kind: input, shape index: {}]   ;;  %s1655_s2 = inlined_call_operand.hbm [shape: f32[3,128,128], index: 2, kind: input, shape index: {}]   ;;  %s1656_s3 = inlined_call_operand.vmem [shape: f32[4,128], index: 3, kind: input, shape index: {}]   ;;  %s1657_s4 = inlined_call_operand.hbm [shape: f32[128,128], index: 4, kind: input, shape index: {}]   ;;  %s1658_s5 = inlined_call_operand.vmem [shape: f32[8,128], index: 5, kind: output, shape index: {}]  }
   0x1   :  { %11 = vsyncpa [#allocation6], 0  ;;  %s31_s20 = sshll.u32 %s1655_s2, 4  ;;  %s1037_s21 = smov [#allocation5]   ;;  %s32_s20 = int_to_ptr.hbm [resolvable:$true] %s31_s20 }
   0x2   :  { %s33_s22 = sshll.u32 %s1037_s21, 4  ;;  %s18_s25 = sshll.u32 %s1654_s1, 4  ;;  %s34_s22 = int_to_ptr.vmem [resolvable:$true] %s33_s22  ;;  %s19_s25 = int_to_ptr.hbm [resolvable:$true] %s18_s25 }
   0x3   :  { %s1038_s26 = smov 128   ;;  %s1039_s27 = smov 8  }
   0x4   :  { %39 = dma.hbm_to_vmem [thread:$0]  %s32_s20, 6144, %s34_s22, [#allocation6], %s1038_s26, %s1038_s26, %s1039_s27  }
   0x5   :  { %s1040_s28 = smov [#allocation3]   ;;  %s46_s7 = sshll.u32 %s1657_s4, 4  ;;  %s47_s7 = int_to_ptr.hbm [resolvable:$true] %s46_s7 }
   0x6   :  { %s20_s29 = sshll.u32 %s1040_s28, 4  ;;  %s1041_s2 = smov [#allocation7]   ;;  %s21_s29 = int_to_ptr.vmem [resolvable:$true] %s20_s29 }
   0x7   :  { %26 = dma.hbm_to_vmem [thread:$0]  %s19_s25, 6144, %s21_s29, [#allocation4], %s1038_s26, %s1038_s26, %s1039_s27  }
   0x8   :  { %s48_s8 = sshll.u32 %s1041_s2, 4  ;;  %s49_s8 = int_to_ptr.vmem [resolvable:$true] %s48_s8 }
   0x9   :  { %54 = dma.hbm_to_vmem [thread:$0]  %s47_s7, 2048, %s49_s8, [#allocation6], %s1038_s26, %s1038_s26, %s1039_s27  }
   0xa   :  { %1033 = dma.done.wait [#allocation4], 6144  }
   0xb   :  { %1034 = vsyncadd [#allocation4], 4294961152 }
   0xc   :  { %1035 = dma.done.wait [#allocation6], 8192  }
   0xd   :  { %1036 = vsyncadd [#allocation6], 4294959104  ;;  %v91_v0 = vld [vmem:[#allocation3 + $0x78] sm:$0xff]  ;;  %v90_v1 = vld [vmem:[#allocation3 + $0x70] sm:$0xff]  ;;  %v1042_v33 = vmov 0.0  }
   0xe   :  { %v1082_v2 = vld [vmem:[#allocation5 + $0x78] sm:$0xff]  ;;  %93 = vmatpush.msra.mxu0 %v91_v0  ;;  %v1085_v3 = vld [vmem:[#allocation5 + $0x70] sm:$0xff]  ;;  %v89_v4 = vld [vmem:[#allocation3 + $0x68] sm:$0xff] }
   0xf   :  { %150 = vmatpush.msra.mxu1 %v1082_v2  ;;  %v1087_v5 = vld [vmem:[#allocation5 + $0x68] sm:$0xff]  ;;  %173 = vmatpush.msra.mxu2 %v1082_v2  ;;  %v88_v6 = vld [vmem:[#allocation3 + $0x60] sm:$0xff]  ;;  %v87_v8 = vld [vmem:[#allocation3 + $0x58] sm:$0xff] }
  0x10   :  { %196 = vmatpush.msra.mxu3 %v1082_v2  ;;  %94 = vmatpush.msra.mxu0 %v90_v1  ;;  %v1092_v7 = vld [vmem:[#allocation5 + $0x60] sm:$0xff]  ;;  %v1097_v9 = vld [vmem:[#allocation5 + $0x58] sm:$0xff]  ;;  %v86_v10 = vld [vmem:[#allocation3 + $0x50] sm:$0xff] }
  0x11   :  { %151 = vmatpush.msra.mxu1 %v1085_v3  ;;  %174 = vmatpush.msra.mxu2 %v1085_v3  ;;  %v1102_v11 = vld [vmem:[#allocation5 + $0x50] sm:$0xff]  ;;  %v85_v12 = vld [vmem:[#allocation3 + $0x48] sm:$0xff]  ;;  %v84_v14 = vld [vmem:[#allocation3 + $0x40] sm:$0xff] }
  0x12   :  { %197 = vmatpush.msra.mxu3 %v1085_v3  ;;  %95 = vmatpush.msra.mxu0 %v89_v4  ;;  %v1107_v13 = vld [vmem:[#allocation5 + $0x48] sm:$0xff]  ;;  %v1112_v15 = vld [vmem:[#allocation5 + $0x40] sm:$0xff]  ;;  %v83_v16 = vld [vmem:[#allocation3 + $0x38] sm:$0xff] }
  0x13   :  { %152 = vmatpush.msra.mxu1 %v1087_v5  ;;  %175 = vmatpush.msra.mxu2 %v1087_v5  ;;  %v1117_v17 = vld [vmem:[#allocation5 + $0x38] sm:$0xff]  ;;  %v82_v18 = vld [vmem:[#allocation3 + $0x30] sm:$0xff]  ;;  %v81_v20 = vld [vmem:[#allocation3 + $0x28] sm:$0xff] }
  0x14   :  { %198 = vmatpush.msra.mxu3 %v1087_v5  ;;  %96 = vmatpush.msra.mxu0 %v88_v6  ;;  %v1122_v19 = vld [vmem:[#allocation5 + $0x30] sm:$0xff]  ;;  %v1127_v21 = vld [vmem:[#allocation5 + $0x28] sm:$0xff]  ;;  %v80_v22 = vld [vmem:[#allocation3 + $0x20] sm:$0xff] }
  0x15   :  { %153 = vmatpush.msra.mxu1 %v1092_v7  ;;  %176 = vmatpush.msra.mxu2 %v1092_v7  ;;  %v1132_v23 = vld [vmem:[#allocation5 + $0x20] sm:$0xff]  ;;  %v79_v24 = vld [vmem:[#allocation3 + $0x18] sm:$0xff]  ;;  %v78_v26 = vld [vmem:[#allocation3 + $0x10] sm:$0xff] }
  0x16   :  { %199 = vmatpush.msra.mxu3 %v1092_v7  ;;  %97 = vmatpush.msra.mxu0 %v87_v8  ;;  %v1137_v25 = vld [vmem:[#allocation5 + $0x18] sm:$0xff]  ;;  %v1142_v27 = vld [vmem:[#allocation5 + $0x10] sm:$0xff]  ;;  %v77_v28 = vld [vmem:[#allocation3 + $0x8] sm:$0xff] }
  0x17   :  { %154 = vmatpush.msra.mxu1 %v1097_v9  ;;  %177 = vmatpush.msra.mxu2 %v1097_v9  ;;  %v1147_v29 = vld [vmem:[#allocation5 + $0x8] sm:$0xff]  ;;  %v76_v30 = vld [vmem:[#allocation3] sm:$0xff]  ;;  %v70_v42 = vld [vmem:[%s1653_s0 + $0x10] sm:$0xff] }
  0x18   :  { %200 = vmatpush.msra.mxu3 %v1097_v9  ;;  %98 = vmatpush.msra.mxu0 %v86_v10  ;;  %v1152_v31 = vld [vmem:[#allocation5] sm:$0xff]  ;;  %v69_v34 = vld [vmem:[%s1653_s0 + $0x8] sm:$0xff]  ;;  %v71_v48 = vld [vmem:[%s1653_s0 + $0x18] sm:$0xff] }
  0x19   :  { %155 = vmatpush.msra.mxu1 %v1102_v11  ;;  %178 = vmatpush.msra.mxu2 %v1102_v11  ;;  %v68_v32 = vld [vmem:[%s1653_s0] sm:$0xff]  ;;  %v358_v49 = vld [vmem:[#allocation3 + $0xf8] sm:$0xff]  ;;  %v357_v50 = vld [vmem:[#allocation3 + $0xf0] sm:$0xff] }
  0x1a   :  { %201 = vmatpush.msra.mxu3 %v1102_v11  ;;  %99 = vmatpush.msra.mxu0 %v85_v12  ;;  %v1252_v35 = vld [vmem:[%s1656_s3] sm:$0xf]  ;;  %v356_v51 = vld [vmem:[#allocation3 + $0xe8] sm:$0xff]  ;;  %v354_v53 = vld [vmem:[#allocation3 + $0xd8] sm:$0xff] }
  0x1b   :  { %156 = vmatpush.msra.mxu1 %v1107_v13  ;;  %179 = vmatpush.msra.mxu2 %v1107_v13  ;;  %v1255_v36 = vperm.slane %v1252_v35, 0  ;;  %v355_v52 = vld [vmem:[#allocation3 + $0xe0] sm:$0xff]  ;;  %v353_v54 = vld [vmem:[#allocation3 + $0xd0] sm:$0xff]  ;;  %v352_v60 = vld [vmem:[#allocation3 + $0xc8] sm:$0xff] }
  0x1c   :  { %202 = vmatpush.msra.mxu3 %v1107_v13  ;;  %100 = vmatpush.msra.mxu0 %v84_v14  ;;  %v351_v61 = vld [vmem:[#allocation3 + $0xc0] sm:$0xff]  ;;  %v350_v62 = vld [vmem:[#allocation3 + $0xb8] sm:$0xff]  ;;  %v349_v63 = vld [vmem:[#allocation3 + $0xb0] sm:$0xff] }
  0x1d   :  { %157 = vmatpush.msra.mxu1 %v1112_v15  ;;  %180 = vmatpush.msra.mxu2 %v1112_v15  ;;  %v348_v0 = vld [vmem:[#allocation3 + $0xa8] sm:$0xff]  ;;  %v347_v1 = vld [vmem:[#allocation3 + $0xa0] sm:$0xff]  ;;  %v1276_v12 = vld [vmem:[#allocation5 + $0xf8] sm:$0xff] }
  0x1e   :  { %203 = vmatpush.msra.mxu3 %v1112_v15  ;;  %101 = vmatpush.msra.mxu0 %v83_v16  ;;  %v72_v4 = vld [vmem:[%s1653_s0 + $0x20] sm:$0xff]  ;;  %v1282_v14 = vld [vmem:[#allocation5 + $0xe8] sm:$0xff]  ;;  %v1294_v16 = vld [vmem:[#allocation5 + $0xd8] sm:$0xff] }
  0x1f   :  { %158 = vmatpush.msra.mxu1 %v1117_v17  ;;  %181 = vmatpush.msra.mxu2 %v1117_v17  ;;  %v343_v6 = vld [vmem:[#allocation3 + $0x80] sm:$0xff] }
  0x20   :  { %204 = vmatpush.msra.mxu3 %v1117_v17  ;;  %102 = vmatpush.msra.mxu0 %v82_v18  ;;  %v1314_v18 = vld [vmem:[#allocation5 + $0xc8] sm:$0xff] }
  0x21   :  { %159 = vmatpush.msra.mxu1 %v1122_v19  ;;  %182 = vmatpush.msra.mxu2 %v1122_v19 }
  0x22   :  { %205 = vmatpush.msra.mxu3 %v1122_v19  ;;  %103 = vmatpush.msra.mxu0 %v81_v20  ;;  %v1324_v20 = vld [vmem:[#allocation5 + $0xb8] sm:$0xff] }
  0x23   :  { %160 = vmatpush.msra.mxu1 %v1127_v21  ;;  %183 = vmatpush.msra.mxu2 %v1127_v21 }
  0x24   :  { %206 = vmatpush.msra.mxu3 %v1127_v21  ;;  %104 = vmatpush.msra.mxu0 %v80_v22  ;;  %v1332_v22 = vld [vmem:[#allocation5 + $0xa8] sm:$0xff] }
  0x25   :  { %161 = vmatpush.msra.mxu1 %v1132_v23  ;;  %184 = vmatpush.msra.mxu2 %v1132_v23 }
  0x26   :  { %207 = vmatpush.msra.mxu3 %v1132_v23  ;;  %105 = vmatpush.msra.mxu0 %v79_v24  ;;  %v1348_v24 = vld [vmem:[#allocation5 + $0x98] sm:$0xff] }
  0x27   :  { %162 = vmatpush.msra.mxu1 %v1137_v25  ;;  %185 = vmatpush.msra.mxu2 %v1137_v25 }
  0x28   :  { %208 = vmatpush.msra.mxu3 %v1137_v25  ;;  %106 = vmatpush.msra.mxu0 %v78_v26  ;;  %v73_v26 = vld [vmem:[%s1653_s0 + $0x28] sm:$0xff] }
  0x29   :  { %163 = vmatpush.msra.mxu1 %v1142_v27  ;;  %186 = vmatpush.msra.mxu2 %v1142_v27 }
  0x2a   :  { %209 = vmatpush.msra.mxu3 %v1142_v27  ;;  %107 = vmatpush.msra.mxu0 %v77_v28  ;;  %v1368_v28 = vld [vmem:[#allocation5 + $0x80] sm:$0xff] }
  0x2b   :  { %164 = vmatpush.msra.mxu1 %v1147_v29  ;;  %187 = vmatpush.msra.mxu2 %v1147_v29 }
  0x2c   :  { %210 = vmatpush.msra.mxu3 %v1147_v29  ;;  %108 = vmatpush.msra.mxu0 %v76_v30 }
  0x2d   :  { %165 = vmatpush.msra.mxu1 %v1152_v31  ;;  %109 = vmatmul.f32.vlgmr.msra.gmra.mxu0 %v68_v32 }
  0x2e   :  { %166 = vmatmul.f32.vlgmr.msra.gmra.mxu1 %v1042_v33  ;;  %188 = vmatpush.msra.mxu2 %v1152_v31 }
  0x2f   :  { %211 = vmatpush.msra.mxu3 %v1152_v31  ;;  %219 = vmatpush.msrb.mxu1 %v1082_v2 }
  0x30   :  { %242 = vmatpush.msrb.mxu2 %v1082_v2  ;;  %288 = vmatpush.msrb.mxu0 %v1082_v2 }
  0x31   :  { %265 = vmatpush.msrb.mxu3 %v1082_v2  ;;  %220 = vmatpush.msrb.mxu1 %v1085_v3 }
  0x32   :  { %243 = vmatpush.msrb.mxu2 %v1085_v3  ;;  %289 = vmatpush.msrb.mxu0 %v1085_v3 }
  0x33   :  { %266 = vmatpush.msrb.mxu3 %v1085_v3  ;;  %221 = vmatpush.msrb.mxu1 %v1087_v5 }
  0x34   :  { %244 = vmatpush.msrb.mxu2 %v1087_v5  ;;  %290 = vmatpush.msrb.mxu0 %v1087_v5 }
  0x35   :  { %267 = vmatpush.msrb.mxu3 %v1087_v5  ;;  %222 = vmatpush.msrb.mxu1 %v1092_v7 }
  0x36   :  { %245 = vmatpush.msrb.mxu2 %v1092_v7  ;;  %291 = vmatpush.msrb.mxu0 %v1092_v7 }
  0x37   :  { %268 = vmatpush.msrb.mxu3 %v1092_v7  ;;  %223 = vmatpush.msrb.mxu1 %v1097_v9 }
  0x38   :  { %246 = vmatpush.msrb.mxu2 %v1097_v9  ;;  %292 = vmatpush.msrb.mxu0 %v1097_v9 }
  0x39   :  { %269 = vmatpush.msrb.mxu3 %v1097_v9  ;;  %224 = vmatpush.msrb.mxu1 %v1102_v11 }
  0x3a   :  { %247 = vmatpush.msrb.mxu2 %v1102_v11  ;;  %293 = vmatpush.msrb.mxu0 %v1102_v11 }
  0x3b   :  { %270 = vmatpush.msrb.mxu3 %v1102_v11  ;;  %225 = vmatpush.msrb.mxu1 %v1107_v13 }
  0x3c   :  { %248 = vmatpush.msrb.mxu2 %v1107_v13  ;;  %294 = vmatpush.msrb.mxu0 %v1107_v13 }
  0x3d   :  { %271 = vmatpush.msrb.mxu3 %v1107_v13  ;;  %226 = vmatpush.msrb.mxu1 %v1112_v15 }
  0x3e   :  { %249 = vmatpush.msrb.mxu2 %v1112_v15  ;;  %295 = vmatpush.msrb.mxu0 %v1112_v15 }
  0x3f   :  { %272 = vmatpush.msrb.mxu3 %v1112_v15  ;;  %227 = vmatpush.msrb.mxu1 %v1117_v17 }
  0x40   :  { %250 = vmatpush.msrb.mxu2 %v1117_v17  ;;  %296 = vmatpush.msrb.mxu0 %v1117_v17 }
  0x41   :  { %273 = vmatpush.msrb.mxu3 %v1117_v17  ;;  %228 = vmatpush.msrb.mxu1 %v1122_v19 }
  0x42   :  { %251 = vmatpush.msrb.mxu2 %v1122_v19  ;;  %297 = vmatpush.msrb.mxu0 %v1122_v19 }
  0x43   :  { %274 = vmatpush.msrb.mxu3 %v1122_v19  ;;  %229 = vmatpush.msrb.mxu1 %v1127_v21 }
  0x44   :  { %252 = vmatpush.msrb.mxu2 %v1127_v21  ;;  %298 = vmatpush.msrb.mxu0 %v1127_v21 }
  0x45   :  { %275 = vmatpush.msrb.mxu3 %v1127_v21  ;;  %230 = vmatpush.msrb.mxu1 %v1132_v23 }
  0x46   :  { %253 = vmatpush.msrb.mxu2 %v1132_v23  ;;  %299 = vmatpush.msrb.mxu0 %v1132_v23 }
  0x47   :  { %276 = vmatpush.msrb.mxu3 %v1132_v23  ;;  %231 = vmatpush.msrb.mxu1 %v1137_v25 }
  0x48   :  { %254 = vmatpush.msrb.mxu2 %v1137_v25  ;;  %300 = vmatpush.msrb.mxu0 %v1137_v25 }
  0x49   :  { %277 = vmatpush.msrb.mxu3 %v1137_v25  ;;  %232 = vmatpush.msrb.mxu1 %v1142_v27 }
  0x4a   :  { %255 = vmatpush.msrb.mxu2 %v1142_v27  ;;  %301 = vmatpush.msrb.mxu0 %v1142_v27 }
  0x4b   :  { %278 = vmatpush.msrb.mxu3 %v1142_v27  ;;  %233 = vmatpush.msrb.mxu1 %v1147_v29 }
  0x4c   :  { %256 = vmatpush.msrb.mxu2 %v1147_v29  ;;  %302 = vmatpush.msrb.mxu0 %v1147_v29 }
  0x4d   :  { %279 = vmatpush.msrb.mxu3 %v1147_v29  ;;  %234 = vmatpush.msrb.mxu1 %v1152_v31 }
  0x4e   :  { %257 = vmatpush.msrb.mxu2 %v1152_v31  ;;  %303 = vmatpush.msrb.mxu0 %v1152_v31 }
  0x4f   :  { %280 = vmatpush.msrb.mxu3 %v1152_v31  ;;  %311 = vmatpush.msra.mxu1 %v1082_v2  ;;  %v346_v2 = vld [vmem:[#allocation3 + $0x98] sm:$0xff] }
  0x50   :  { %112 = vmatmul.f32.gmra.mxu0 %v69_v34  ;;  %v74_v34 = vld [vmem:[%s1653_s0 + $0x30] sm:$0xff] }
  0x51   :  { %312 = vmatpush.msra.mxu1 %v1085_v3  ;;  %v345_v3 = vld [vmem:[#allocation3 + $0x90] sm:$0xff]  ;;  %441 = vmatpush.msra.mxu0 %v1276_v12 }
  0x53   :  { %313 = vmatpush.msra.mxu1 %v1087_v5  ;;  %v344_v5 = vld [vmem:[#allocation3 + $0x88] sm:$0xff] }
  0x55   :  { %314 = vmatpush.msra.mxu1 %v1092_v7 }
  0x57   :  { %315 = vmatpush.msra.mxu1 %v1097_v9 }
  0x58   :  { %115 = vmatmul.f32.gmra.mxu0 %v70_v42 }
  0x59   :  { %316 = vmatpush.msra.mxu1 %v1102_v11 }
  0x5b   :  { %317 = vmatpush.msra.mxu1 %v1107_v13  ;;  %v1278_v13 = vld [vmem:[#allocation5 + $0xf0] sm:$0xff] }
  0x5c   :  { %442 = vmatpush.msra.mxu0 %v1278_v13 }
  0x5d   :  { %318 = vmatpush.msra.mxu1 %v1112_v15  ;;  %v1288_v15 = vld [vmem:[#allocation5 + $0xe0] sm:$0xff] }
  0x5e   :  { %443 = vmatpush.msra.mxu0 %v1282_v14 }
  0x5f   :  { %319 = vmatpush.msra.mxu1 %v1117_v17  ;;  %v1301_v17 = vld [vmem:[#allocation5 + $0xd0] sm:$0xff] }
  0x60   :  { %118 = vmatmul.f32.gmra.mxu0 %v71_v48 }
  0x61   :  { %320 = vmatpush.msra.mxu1 %v1122_v19  ;;  %444 = vmatpush.msra.mxu0 %v1288_v15  ;;  %v1320_v19 = vld [vmem:[#allocation5 + $0xc0] sm:$0xff] }
  0x63   :  { %321 = vmatpush.msra.mxu1 %v1127_v21  ;;  %445 = vmatpush.msra.mxu0 %v1294_v16  ;;  %v1329_v21 = vld [vmem:[#allocation5 + $0xb0] sm:$0xff] }
  0x65   :  { %322 = vmatpush.msra.mxu1 %v1132_v23  ;;  %446 = vmatpush.msra.mxu0 %v1301_v17  ;;  %v1342_v23 = vld [vmem:[#allocation5 + $0xa0] sm:$0xff] }
  0x67   :  { %323 = vmatpush.msra.mxu1 %v1137_v25  ;;  %447 = vmatpush.msra.mxu0 %v1314_v18  ;;  %v1350_v25 = vld [vmem:[#allocation5 + $0x90] sm:$0xff] }
  0x68   :  { %121 = vmatmul.f32.gmra.mxu0 %v72_v4 }
  0x69   :  { %324 = vmatpush.msra.mxu1 %v1142_v27  ;;  %448 = vmatpush.msra.mxu0 %v1320_v19  ;;  %v1358_v27 = vld [vmem:[#allocation5 + $0x88] sm:$0xff] }
  0x6b   :  { %325 = vmatpush.msra.mxu1 %v1147_v29  ;;  %449 = vmatpush.msra.mxu0 %v1324_v20 }
  0x6d   :  { %326 = vmatpush.msra.mxu1 %v1152_v31  ;;  %450 = vmatpush.msra.mxu0 %v1329_v21 }
  0x6f   :  { %451 = vmatpush.msra.mxu0 %v1332_v22 }
  0x70   :  { %124 = vmatmul.f32.gmra.mxu0 %v73_v26  ;;  %v1468_v26 = vld [vmem:[#allocation5 + $0x178] sm:$0xff] }
  0x71   :  { %452 = vmatpush.msra.mxu0 %v1342_v23 }
  0x73   :  { %453 = vmatpush.msra.mxu0 %v1348_v24 }
  0x75   :  { %454 = vmatpush.msra.mxu0 %v1350_v25 }
  0x77   :  { %455 = vmatpush.msra.mxu0 %v1358_v27 }
  0x78   :  { %127 = vmatmul.f32.gmra.mxu0 %v74_v34  ;;  %v1513_v34 = vld [vmem:[#allocation5 + $0x140] sm:$0xff] }
  0x79   :  { %456 = vmatpush.msra.mxu0 %v1368_v28 }
  0xaa   :  { %v110_v37 = vpop.f32.mrf.mxu0 }
  0xab   :  { %v167_v38 = vpop.f32.mrf.mxu1  ;;  %v111_v39 = vadd.f32 %v110_v37, %v1255_v36 }
  0xad   :  { %v170_v40 = vadd.f32 %v167_v38, %v111_v39  ;;  %v75_v38 = vld [vmem:[%s1653_s0 + $0x38] sm:$0xff] }
  0xae   :  { %130 = vmatmul.f32.gmra.mxu0 %v75_v38  ;;  %v1522_v38 = vld [vmem:[#allocation5 + $0x130] sm:$0xff] }
  0xaf   :  { %912 = vtanh.f32 %v170_v40 }
  0xb5   :  { %v1258_v41 = vpop.eup %912 }
  0xb6   :  { %189 = vmatmul.f32.vlgmr.msra.gmra.mxu2 %v1258_v41 }
  0xb7   :  { %360 = vmatpush.msra.mxu2 %v358_v49 }
  0xb9   :  { %361 = vmatpush.msra.mxu2 %v357_v50 }
  0xbb   :  { %362 = vmatpush.msra.mxu2 %v356_v51 }
  0xbd   :  { %363 = vmatpush.msra.mxu2 %v355_v52 }
  0xbf   :  { %364 = vmatpush.msra.mxu2 %v354_v53 }
  0xc1   :  { %365 = vmatpush.msra.mxu2 %v353_v54 }
  0xc3   :  { %366 = vmatpush.msra.mxu2 %v352_v60 }
  0xc5   :  { %367 = vmatpush.msra.mxu2 %v351_v61  ;;  %v626_v61 = vld [vmem:[#allocation3 + $0x178] sm:$0xff] }
  0xc7   :  { %368 = vmatpush.msra.mxu2 %v350_v62  ;;  %v625_v62 = vld [vmem:[#allocation3 + $0x170] sm:$0xff] }
  0xc9   :  { %369 = vmatpush.msra.mxu2 %v349_v63  ;;  %v624_v63 = vld [vmem:[#allocation3 + $0x168] sm:$0xff] }
  0xcb   :  { %370 = vmatpush.msra.mxu2 %v348_v0 }
  0xcd   :  { %v113_v43 = vpop.f32.mrf.mxu0  ;;  %371 = vmatpush.msra.mxu2 %v347_v1 }
  0xce   :  { %v114_v44 = vadd.f32 %v113_v43, %v1255_v36  ;;  %v1419_v43 = vperm.slane %v1252_v35, 1 }
  0xcf   :  { %372 = vmatpush.msra.mxu2 %v346_v2 }
  0xd1   :  { %373 = vmatpush.msra.mxu2 %v345_v3 }
  0xd3   :  { %374 = vmatpush.msra.mxu2 %v344_v5 }
  0xd5   :  { %v116_v55 = vpop.f32.mrf.mxu0  ;;  %375 = vmatpush.msra.mxu2 %v343_v6 }
  0xd6   :  { %v117_v56 = vadd.f32 %v116_v55, %v1255_v36 }
  0xdd   :  { %v119_v7 = vpop.f32.mrf.mxu0 }
  0xde   :  { %v120_v8 = vadd.f32 %v119_v7, %v1255_v36 }
  0xe5   :  { %v122_v29 = vpop.f32.mrf.mxu0 }
  0xe6   :  { %v123_v30 = vadd.f32 %v122_v29, %v1255_v36  ;;  %v1480_v29 = vld [vmem:[#allocation5 + $0x160] sm:$0xff] }
  0xed   :  { %v125_v39 = vpop.f32.mrf.mxu0 }
  0xee   :  { %v126_v40 = vadd.f32 %v125_v39, %v1255_v36  ;;  %v1525_v39 = vld [vmem:[#allocation5 + $0x128] sm:$0xff] }
  0xf5   :  { %v128_v50 = vpop.f32.mrf.mxu0 }
  0xf6   :  { %v129_v52 = vadd.f32 %v128_v50, %v1255_v36 }
 0x12b   :  { %v131_v51 = vpop.f32.mrf.mxu0 }
 0x12c   :  { %v132_v0 = vadd.f32 %v131_v51, %v1255_v36  ;;  %v620_v36 = vld [vmem:[#allocation3 + $0x148] sm:$0xff] }
 0x139   :  { %v190_v45 = vpop.f32.mrf.mxu2 }
 0x13a   :  { %v193_v46 = vadd.f32 %v190_v45, %v114_v44 }
 0x13c   :  { %914 = vtanh.f32 %v193_v46 }
 0x142   :  { %v1265_v47 = vpop.eup %914 }
 0x143   :  { %212 = vmatmul.f32.vlgmr.msra.gmra.mxu3 %v1265_v47 }
 0x144   :  { %418 = vmatpush.msra.mxu3 %v1276_v12 }
 0x146   :  { %419 = vmatpush.msra.mxu3 %v1278_v13 }
 0x148   :  { %420 = vmatpush.msra.mxu3 %v1282_v14 }
 0x14a   :  { %421 = vmatpush.msra.mxu3 %v1288_v15 }
 0x14c   :  { %422 = vmatpush.msra.mxu3 %v1294_v16 }
 0x14e   :  { %423 = vmatpush.msra.mxu3 %v1301_v17 }
 0x150   :  { %424 = vmatpush.msra.mxu3 %v1314_v18 }
 0x152   :  { %425 = vmatpush.msra.mxu3 %v1320_v19 }
 0x154   :  { %426 = vmatpush.msra.mxu3 %v1324_v20 }
 0x156   :  { %427 = vmatpush.msra.mxu3 %v1329_v21 }
 0x158   :  { %428 = vmatpush.msra.mxu3 %v1332_v22 }
 0x15a   :  { %429 = vmatpush.msra.mxu3 %v1342_v23 }
 0x15c   :  { %430 = vmatpush.msra.mxu3 %v1348_v24 }
 0x15e   :  { %431 = vmatpush.msra.mxu3 %v1350_v25 }
 0x160   :  { %432 = vmatpush.msra.mxu3 %v1358_v27 }
 0x162   :  { %433 = vmatpush.msra.mxu3 %v1368_v28 }
 0x1c6   :  { %v213_v57 = vpop.f32.mrf.mxu3 }
 0x1c7   :  { %v216_v58 = vadd.f32 %v213_v57, %v117_v56 }
 0x1c9   :  { %916 = vtanh.f32 %v216_v58 }
 0x1cf   :  { %v917_v59 = vpop.eup %916 }
 0x1d0   :  { %235 = vmatmul.f32.vlgmr.msrb.gmra.mxu1 %v917_v59 }
 0x1d1   :  { %464 = vmatpush.msrb.mxu1 %v1276_v12 }
 0x1d3   :  { %465 = vmatpush.msrb.mxu1 %v1278_v13 }
 0x1d5   :  { %466 = vmatpush.msrb.mxu1 %v1282_v14 }
 0x1d7   :  { %467 = vmatpush.msrb.mxu1 %v1288_v15 }
 0x1d9   :  { %468 = vmatpush.msrb.mxu1 %v1294_v16 }
 0x1db   :  { %469 = vmatpush.msrb.mxu1 %v1301_v17 }
 0x1dd   :  { %470 = vmatpush.msrb.mxu1 %v1314_v18 }
 0x1df   :  { %471 = vmatpush.msrb.mxu1 %v1320_v19 }
 0x1e1   :  { %472 = vmatpush.msrb.mxu1 %v1324_v20 }
 0x1e3   :  { %473 = vmatpush.msrb.mxu1 %v1329_v21 }
 0x1e5   :  { %474 = vmatpush.msrb.mxu1 %v1332_v22 }
 0x1e7   :  { %475 = vmatpush.msrb.mxu1 %v1342_v23 }
 0x1e9   :  { %476 = vmatpush.msrb.mxu1 %v1348_v24 }
 0x1eb   :  { %477 = vmatpush.msrb.mxu1 %v1350_v25 }
 0x1ed   :  { %478 = vmatpush.msrb.mxu1 %v1358_v27 }
 0x1ef   :  { %479 = vmatpush.msrb.mxu1 %v1368_v28 }
 0x24d   :  { %v236_v9 = vpop.f32.mrf.mxu1 }
 0x24e   :  { %v239_v10 = vadd.f32 %v236_v9, %v120_v8  ;;  %v623_v9 = vld [vmem:[#allocation3 + $0x160] sm:$0xff] }
 0x250   :  { %918 = vtanh.f32 %v239_v10  ;;  %v622_v10 = vld [vmem:[#allocation3 + $0x158] sm:$0xff] }
 0x256   :  { %v919_v11 = vpop.eup %918 }
 0x257   :  { %258 = vmatmul.f32.vlgmr.msrb.gmra.mxu2 %v919_v11 }
 0x258   :  { %556 = vmatpush.msrb.mxu2 %v1276_v12 }
 0x25a   :  { %557 = vmatpush.msrb.mxu2 %v1278_v13 }
 0x25c   :  { %558 = vmatpush.msrb.mxu2 %v1282_v14 }
 0x25e   :  { %559 = vmatpush.msrb.mxu2 %v1288_v15 }
 0x25f   :  { %376 = vmatmul.f32.vlgmr.msra.gmra.mxu2 %v1258_v41 }
 0x260   :  { %560 = vmatpush.msrb.mxu2 %v1294_v16 }
 0x262   :  { %561 = vmatpush.msrb.mxu2 %v1301_v17 }
 0x264   :  { %562 = vmatpush.msrb.mxu2 %v1314_v18 }
 0x266   :  { %563 = vmatpush.msrb.mxu2 %v1320_v19 }
 0x267   :  { %379 = vmatmul.f32.gmra.mxu2 %v1265_v47 }
 0x268   :  { %564 = vmatpush.msrb.mxu2 %v1324_v20 }
 0x26a   :  { %565 = vmatpush.msrb.mxu2 %v1329_v21 }
 0x26c   :  { %566 = vmatpush.msrb.mxu2 %v1332_v22 }
 0x26e   :  { %567 = vmatpush.msrb.mxu2 %v1342_v23 }
 0x26f   :  { %382 = vmatmul.f32.gmra.mxu2 %v917_v59 }
 0x270   :  { %568 = vmatpush.msrb.mxu2 %v1348_v24 }
 0x272   :  { %569 = vmatpush.msrb.mxu2 %v1350_v25 }
 0x274   :  { %570 = vmatpush.msrb.mxu2 %v1358_v27 }
 0x276   :  { %571 = vmatpush.msrb.mxu2 %v1368_v28 }
 0x277   :  { %385 = vmatmul.f32.gmra.mxu2 %v919_v11  ;;  %v621_v11 = vld [vmem:[#allocation3 + $0x150] sm:$0xff] }
 0x278   :  { %708 = vmatpush.msra.mxu2 %v1468_v26 }
 0x2da   :  { %v259_v31 = vpop.f32.mrf.mxu2 }
 0x2db   :  { %v262_v32 = vadd.f32 %v259_v31, %v123_v30  ;;  %v1486_v30 = vld [vmem:[#allocation5 + $0x158] sm:$0xff]  ;;  %v1493_v31 = vld [vmem:[#allocation5 + $0x150] sm:$0xff] }
 0x2dd   :  { %920 = vtanh.f32 %v262_v32  ;;  %v1498_v32 = vld [vmem:[#allocation5 + $0x148] sm:$0xff] }
 0x2e2   :  { %v377_v44 = vpop.f32.mrf.mxu2 }
 0x2e3   :  { %v921_v37 = vpop.eup %920  ;;  %v378_v45 = vadd.f32 %v377_v44, %v1419_v43  ;;  %v1549_v44 = vld [vmem:[#allocation5 + $0x108] sm:$0xff] }
 0x2e4   :  { %281 = vmatmul.f32.vlgmr.msrb.gmra.mxu3 %v921_v37  ;;  %388 = vmatmul.f32.gmra.mxu2 %v921_v37  ;;  %v1517_v37 = vld [vmem:[#allocation5 + $0x138] sm:$0xff] }
 0x2e5   :  { %487 = vmatpush.msrb.mxu3 %v1276_v12 }
 0x2e7   :  { %488 = vmatpush.msrb.mxu3 %v1278_v13 }
 0x2e9   :  { %489 = vmatpush.msrb.mxu3 %v1282_v14 }
 0x2ea   :  { %v380_v55 = vpop.f32.mrf.mxu2 }
 0x2eb   :  { %490 = vmatpush.msrb.mxu3 %v1288_v15  ;;  %v381_v56 = vadd.f32 %v380_v55, %v1419_v43 }
 0x2ec   :  { %434 = vmatmul.f32.vlgmr.msra.gmra.mxu3 %v1042_v33 }
 0x2ed   :  { %491 = vmatpush.msrb.mxu3 %v1294_v16 }
 0x2ef   :  { %492 = vmatpush.msrb.mxu3 %v1301_v17 }
 0x2f1   :  { %493 = vmatpush.msrb.mxu3 %v1314_v18 }
 0x2f2   :  { %v383_v3 = vpop.f32.mrf.mxu2 }
 0x2f3   :  { %494 = vmatpush.msrb.mxu3 %v1320_v19  ;;  %v384_v4 = vadd.f32 %v383_v3, %v1419_v43 }
 0x2f5   :  { %495 = vmatpush.msrb.mxu3 %v1324_v20 }
 0x2f7   :  { %496 = vmatpush.msrb.mxu3 %v1329_v21 }
 0x2f9   :  { %497 = vmatpush.msrb.mxu3 %v1332_v22 }
 0x2fb   :  { %498 = vmatpush.msrb.mxu3 %v1342_v23 }
 0x2fd   :  { %499 = vmatpush.msrb.mxu3 %v1348_v24 }
 0x2ff   :  { %500 = vmatpush.msrb.mxu3 %v1350_v25 }
 0x301   :  { %501 = vmatpush.msrb.mxu3 %v1358_v27 }
 0x303   :  { %502 = vmatpush.msrb.mxu3 %v1368_v28 }
 0x305   :  { %579 = vmatpush.msra.mxu3 %v1276_v12 }
 0x307   :  { %580 = vmatpush.msra.mxu3 %v1278_v13 }
 0x309   :  { %581 = vmatpush.msra.mxu3 %v1282_v14 }
 0x30b   :  { %582 = vmatpush.msra.mxu3 %v1288_v15 }
 0x30d   :  { %583 = vmatpush.msra.mxu3 %v1294_v16 }
 0x30f   :  { %584 = vmatpush.msra.mxu3 %v1301_v17 }
 0x311   :  { %585 = vmatpush.msra.mxu3 %v1314_v18 }
 0x313   :  { %586 = vmatpush.msra.mxu3 %v1320_v19 }
 0x315   :  { %587 = vmatpush.msra.mxu3 %v1324_v20 }
 0x317   :  { %588 = vmatpush.msra.mxu3 %v1329_v21 }
 0x319   :  { %589 = vmatpush.msra.mxu3 %v1332_v22 }
 0x31b   :  { %590 = vmatpush.msra.mxu3 %v1342_v23 }
 0x31d   :  { %591 = vmatpush.msra.mxu3 %v1348_v24 }
 0x31f   :  { %592 = vmatpush.msra.mxu3 %v1350_v25 }
 0x321   :  { %593 = vmatpush.msra.mxu3 %v1358_v27 }
 0x323   :  { %594 = vmatpush.msra.mxu3 %v1368_v28 }
 0x367   :  { %v282_v41 = vpop.f32.mrf.mxu3 }
 0x368   :  { %v285_v42 = vadd.f32 %v282_v41, %v126_v40  ;;  %v1535_v40 = vld [vmem:[#allocation5 + $0x120] sm:$0xff]  ;;  %v1541_v41 = vld [vmem:[#allocation5 + $0x118] sm:$0xff] }
 0x36a   :  { %922 = vtanh.f32 %v285_v42  ;;  %v1543_v42 = vld [vmem:[#allocation5 + $0x110] sm:$0xff] }
 0x36f   :  { %v435_v46 = vpop.f32.mrf.mxu3 }
 0x370   :  { %v923_v47 = vpop.eup %922  ;;  %v438_v48 = vadd.f32 %v435_v46, %v378_v45  ;;  %v1559_v45 = vld [vmem:[#allocation5 + $0x100] sm:$0xff] }
 0x371   :  { %304 = vmatmul.f32.vlgmr.msrb.gmra.mxu0 %v923_v47  ;;  %391 = vmatmul.f32.gmra.mxu2 %v923_v47 }
 0x372   :  { %924 = vtanh.f32 %v438_v48  ;;  %510 = vmatpush.msrb.mxu0 %v1276_v12 }
 0x374   :  { %511 = vmatpush.msrb.mxu0 %v1278_v13 }
 0x376   :  { %512 = vmatpush.msrb.mxu0 %v1282_v14 }
 0x378   :  { %v1425_v49 = vpop.eup %924  ;;  %513 = vmatpush.msrb.mxu0 %v1288_v15 }
 0x379   :  { %457 = vmatmul.f32.vlgmr.msra.gmra.mxu0 %v1425_v49 }
 0x37a   :  { %514 = vmatpush.msrb.mxu0 %v1294_v16 }
 0x37c   :  { %515 = vmatpush.msrb.mxu0 %v1301_v17 }
 0x37e   :  { %516 = vmatpush.msrb.mxu0 %v1314_v18 }
 0x380   :  { %517 = vmatpush.msrb.mxu0 %v1320_v19 }
 0x382   :  { %518 = vmatpush.msrb.mxu0 %v1324_v20 }
 0x384   :  { %519 = vmatpush.msrb.mxu0 %v1329_v21 }
 0x386   :  { %520 = vmatpush.msrb.mxu0 %v1332_v22 }
 0x388   :  { %521 = vmatpush.msrb.mxu0 %v1342_v23 }
 0x38a   :  { %522 = vmatpush.msrb.mxu0 %v1348_v24 }
 0x38c   :  { %523 = vmatpush.msrb.mxu0 %v1350_v25 }
 0x38e   :  { %524 = vmatpush.msrb.mxu0 %v1358_v27 }
 0x390   :  { %525 = vmatpush.msrb.mxu0 %v1368_v28 }
 0x392   :  { %628 = vmatpush.msra.mxu0 %v626_v61 }
 0x394   :  { %629 = vmatpush.msra.mxu0 %v625_v62 }
 0x396   :  { %630 = vmatpush.msra.mxu0 %v624_v63 }
 0x398   :  { %631 = vmatpush.msra.mxu0 %v623_v9 }
 0x39a   :  { %632 = vmatpush.msra.mxu0 %v622_v10 }
 0x39c   :  { %633 = vmatpush.msra.mxu0 %v621_v11 }
 0x39e   :  { %634 = vmatpush.msra.mxu0 %v620_v36 }
 0x3ee   :  { %v305_v53 = vpop.f32.mrf.mxu0 }
 0x3ef   :  { %v308_v54 = vadd.f32 %v305_v53, %v129_v52 }
 0x3f1   :  { %926 = vtanh.f32 %v308_v54  ;;  %v1603_v54 = vperm.slane %v1252_v35, 2 }
 0x3f6   :  { %v458_v57 = vpop.f32.mrf.mxu0 }
 0x3f7   :  { %v927_v58 = vpop.eup %926  ;;  %v461_v59 = vadd.f32 %v458_v57, %v381_v56 }
 0x3f8   :  { %327 = vmatmul.f32.vlgmr.msra.gmra.mxu1 %v927_v58  ;;  %394 = vmatmul.f32.gmra.mxu2 %v927_v58 }
 0x3f9   :  { %928 = vtanh.f32 %v461_v59  ;;  %533 = vmatpush.msra.mxu1 %v1276_v12  ;;  %v619_v12 = vld [vmem:[#allocation3 + $0x140] sm:$0xff] }
 0x3fa   :  { %635 = vmatpush.msra.mxu0 %v619_v12 }
 0x3fb   :  { %534 = vmatpush.msra.mxu1 %v1278_v13  ;;  %v618_v13 = vld [vmem:[#allocation3 + $0x138] sm:$0xff] }
 0x3fc   :  { %636 = vmatpush.msra.mxu0 %v618_v13 }
 0x3fd   :  { %535 = vmatpush.msra.mxu1 %v1282_v14  ;;  %v617_v14 = vld [vmem:[#allocation3 + $0x130] sm:$0xff] }
 0x3fe   :  { %637 = vmatpush.msra.mxu0 %v617_v14 }
 0x3ff   :  { %v1446_v60 = vpop.eup %928  ;;  %536 = vmatpush.msra.mxu1 %v1288_v15  ;;  %v616_v15 = vld [vmem:[#allocation3 + $0x128] sm:$0xff] }
 0x400   :  { %480 = vmatmul.f32.vlgmr.msrb.gmra.mxu1 %v1446_v60  ;;  %638 = vmatpush.msra.mxu0 %v616_v15 }
 0x401   :  { %537 = vmatpush.msra.mxu1 %v1294_v16  ;;  %v615_v16 = vld [vmem:[#allocation3 + $0x120] sm:$0xff] }
 0x402   :  { %639 = vmatpush.msra.mxu0 %v615_v16 }
 0x403   :  { %538 = vmatpush.msra.mxu1 %v1301_v17  ;;  %v614_v17 = vld [vmem:[#allocation3 + $0x118] sm:$0xff] }
 0x404   :  { %640 = vmatpush.msra.mxu0 %v614_v17 }
 0x405   :  { %539 = vmatpush.msra.mxu1 %v1314_v18  ;;  %v613_v18 = vld [vmem:[#allocation3 + $0x110] sm:$0xff] }
 0x406   :  { %641 = vmatpush.msra.mxu0 %v613_v18 }
 0x407   :  { %540 = vmatpush.msra.mxu1 %v1320_v19  ;;  %v612_v19 = vld [vmem:[#allocation3 + $0x108] sm:$0xff] }
 0x408   :  { %642 = vmatpush.msra.mxu0 %v612_v19 }
 0x409   :  { %541 = vmatpush.msra.mxu1 %v1324_v20  ;;  %v611_v20 = vld [vmem:[#allocation3 + $0x100] sm:$0xff] }
 0x40a   :  { %643 = vmatpush.msra.mxu0 %v611_v20 }
 0x40b   :  { %542 = vmatpush.msra.mxu1 %v1329_v21  ;;  %v386_v21 = vpop.f32.mrf.mxu2 }
 0x40d   :  { %543 = vmatpush.msra.mxu1 %v1332_v22  ;;  %v387_v22 = vadd.f32 %v386_v21, %v1419_v43 }
 0x40f   :  { %544 = vmatpush.msra.mxu1 %v1342_v23 }
 0x411   :  { %545 = vmatpush.msra.mxu1 %v1348_v24 }
 0x413   :  { %546 = vmatpush.msra.mxu1 %v1350_v25  ;;  %v389_v46 = vpop.f32.mrf.mxu2 }
 0x414   :  { %v390_v47 = vadd.f32 %v389_v46, %v1419_v43 }
 0x415   :  { %547 = vmatpush.msra.mxu1 %v1358_v27  ;;  %v1470_v27 = vld [vmem:[#allocation5 + $0x170] sm:$0xff] }
 0x416   :  { %709 = vmatpush.msra.mxu2 %v1470_v27 }
 0x417   :  { %548 = vmatpush.msra.mxu1 %v1368_v28  ;;  %v1474_v28 = vld [vmem:[#allocation5 + $0x168] sm:$0xff] }
 0x418   :  { %710 = vmatpush.msra.mxu2 %v1474_v28 }
 0x419   :  { %686 = vmatpush.msrb.mxu1 %v1468_v26 }
 0x41a   :  { %711 = vmatpush.msra.mxu2 %v1480_v29 }
 0x41b   :  { %687 = vmatpush.msrb.mxu1 %v1470_v27 }
 0x41c   :  { %712 = vmatpush.msra.mxu2 %v1486_v30 }
 0x41d   :  { %688 = vmatpush.msrb.mxu1 %v1474_v28 }
 0x41e   :  { %713 = vmatpush.msra.mxu2 %v1493_v31 }
 0x41f   :  { %689 = vmatpush.msrb.mxu1 %v1480_v29 }
 0x420   :  { %714 = vmatpush.msra.mxu2 %v1498_v32 }
 0x421   :  { %690 = vmatpush.msrb.mxu1 %v1486_v30 }
 0x422   :  { %715 = vmatpush.msra.mxu2 %v1513_v34 }
 0x423   :  { %691 = vmatpush.msrb.mxu1 %v1493_v31 }
 0x424   :  { %716 = vmatpush.msra.mxu2 %v1517_v37 }
 0x425   :  { %692 = vmatpush.msrb.mxu1 %v1498_v32 }
 0x426   :  { %717 = vmatpush.msra.mxu2 %v1522_v38 }
 0x427   :  { %693 = vmatpush.msrb.mxu1 %v1513_v34 }
 0x428   :  { %718 = vmatpush.msra.mxu2 %v1525_v39 }
 0x429   :  { %694 = vmatpush.msrb.mxu1 %v1517_v37 }
 0x42a   :  { %719 = vmatpush.msra.mxu2 %v1535_v40 }
 0x42b   :  { %695 = vmatpush.msrb.mxu1 %v1522_v38 }
 0x42c   :  { %720 = vmatpush.msra.mxu2 %v1541_v41 }
 0x42d   :  { %696 = vmatpush.msrb.mxu1 %v1525_v39 }
 0x42e   :  { %721 = vmatpush.msra.mxu2 %v1543_v42 }
 0x42f   :  { %697 = vmatpush.msrb.mxu1 %v1535_v40 }
 0x430   :  { %722 = vmatpush.msra.mxu2 %v1549_v44 }
 0x431   :  { %698 = vmatpush.msrb.mxu1 %v1541_v41 }
 0x432   :  { %723 = vmatpush.msra.mxu2 %v1559_v45 }
 0x433   :  { %699 = vmatpush.msrb.mxu1 %v1543_v42 }
 0x435   :  { %700 = vmatpush.msrb.mxu1 %v1549_v44 }
 0x437   :  { %701 = vmatpush.msrb.mxu1 %v1559_v45 }
 0x475   :  { %v328_v1 = vpop.f32.mrf.mxu1 }
 0x476   :  { %v331_v2 = vadd.f32 %v328_v1, %v132_v0 }
 0x478   :  { %930 = vtanh.f32 %v331_v2 }
 0x47d   :  { %v481_v5 = vpop.f32.mrf.mxu1 }
 0x47e   :  { %v931_v6 = vpop.eup %930  ;;  %v484_v7 = vadd.f32 %v481_v5, %v384_v4 }
 0x47f   :  { %397 = vmatmul.f32.gmra.mxu2 %v931_v6 }
 0x480   :  { %932 = vtanh.f32 %v484_v7 }
 0x486   :  { %v1464_v8 = vpop.eup %932 }
 0x487   :  { %503 = vmatmul.f32.vlgmr.msrb.gmra.mxu3 %v1464_v8 }
 0x488   :  { %730 = vmatpush.msrb.mxu3 %v1468_v26 }
 0x48a   :  { %731 = vmatpush.msrb.mxu3 %v1470_v27 }
 0x48c   :  { %732 = vmatpush.msrb.mxu3 %v1474_v28 }
 0x48e   :  { %733 = vmatpush.msrb.mxu3 %v1480_v29 }
 0x490   :  { %734 = vmatpush.msrb.mxu3 %v1486_v30 }
 0x492   :  { %735 = vmatpush.msrb.mxu3 %v1493_v31 }
 0x494   :  { %736 = vmatpush.msrb.mxu3 %v1498_v32 }
 0x496   :  { %737 = vmatpush.msrb.mxu3 %v1513_v34 }
 0x498   :  { %738 = vmatpush.msrb.mxu3 %v1517_v37 }
 0x49a   :  { %739 = vmatpush.msrb.mxu3 %v1522_v38 }
 0x49c   :  { %740 = vmatpush.msrb.mxu3 %v1525_v39 }
 0x49e   :  { %741 = vmatpush.msrb.mxu3 %v1535_v40 }
 0x4a0   :  { %742 = vmatpush.msrb.mxu3 %v1541_v41 }
 0x4a2   :  { %743 = vmatpush.msrb.mxu3 %v1543_v42 }
 0x4a4   :  { %744 = vmatpush.msrb.mxu3 %v1549_v44 }
 0x4a6   :  { %745 = vmatpush.msrb.mxu3 %v1559_v45 }
 0x50a   :  { %v504_v23 = vpop.f32.mrf.mxu3 }
 0x50b   :  { %v507_v24 = vadd.f32 %v504_v23, %v387_v22 }
 0x50d   :  { %934 = vtanh.f32 %v507_v24 }
 0x513   :  { %v935_v25 = vpop.eup %934 }
 0x514   :  { %526 = vmatmul.f32.vlgmr.msrb.gmra.mxu0 %v935_v25 }
 0x515   :  { %818 = vmatpush.msrb.mxu0 %v1468_v26 }
 0x517   :  { %819 = vmatpush.msrb.mxu0 %v1470_v27 }
 0x519   :  { %820 = vmatpush.msrb.mxu0 %v1474_v28 }
 0x51b   :  { %821 = vmatpush.msrb.mxu0 %v1480_v29 }
 0x51c   :  { %644 = vmatmul.f32.vlgmr.msra.gmra.mxu0 %v1425_v49 }
 0x51d   :  { %822 = vmatpush.msrb.mxu0 %v1486_v30 }
 0x51f   :  { %823 = vmatpush.msrb.mxu0 %v1493_v31 }
 0x521   :  { %824 = vmatpush.msrb.mxu0 %v1498_v32 }
 0x523   :  { %825 = vmatpush.msrb.mxu0 %v1513_v34 }
 0x524   :  { %647 = vmatmul.f32.gmra.mxu0 %v1446_v60 }
 0x525   :  { %826 = vmatpush.msrb.mxu0 %v1517_v37 }
 0x527   :  { %827 = vmatpush.msrb.mxu0 %v1522_v38 }
 0x529   :  { %828 = vmatpush.msrb.mxu0 %v1525_v39 }
 0x52b   :  { %829 = vmatpush.msrb.mxu0 %v1535_v40 }
 0x52c   :  { %650 = vmatmul.f32.gmra.mxu0 %v1464_v8 }
 0x52d   :  { %830 = vmatpush.msrb.mxu0 %v1541_v41 }
 0x52f   :  { %831 = vmatpush.msrb.mxu0 %v1543_v42 }
 0x531   :  { %832 = vmatpush.msrb.mxu0 %v1549_v44 }
 0x533   :  { %833 = vmatpush.msrb.mxu0 %v1559_v45 }
 0x534   :  { %653 = vmatmul.f32.gmra.mxu0 %v935_v25 }
 0x591   :  { %v527_v48 = vpop.f32.mrf.mxu0 }
 0x592   :  { %v530_v49 = vadd.f32 %v527_v48, %v390_v47 }
 0x594   :  { %936 = vtanh.f32 %v530_v49 }
 0x599   :  { %v645_v55 = vpop.f32.mrf.mxu0 }
 0x59a   :  { %v937_v50 = vpop.eup %936  ;;  %v646_v56 = vadd.f32 %v645_v55, %v1603_v54 }
 0x59b   :  { %549 = vmatmul.f32.vlgmr.msra.gmra.mxu1 %v937_v50  ;;  %656 = vmatmul.f32.gmra.mxu0 %v937_v50  ;;  %v866_v50 = vld [vmem:[#allocation7 + $0x20] sm:$0xff] }
 0x59c   :  { %752 = vmatpush.msra.mxu1 %v1468_v26 }
 0x59e   :  { %753 = vmatpush.msra.mxu1 %v1470_v27 }
 0x5a0   :  { %754 = vmatpush.msra.mxu1 %v1474_v28 }
 0x5a1   :  { %v648_v1 = vpop.f32.mrf.mxu0 }
 0x5a2   :  { %755 = vmatpush.msra.mxu1 %v1480_v29  ;;  %v649_v2 = vadd.f32 %v648_v1, %v1603_v54 }
 0x5a3   :  { %702 = vmatmul.f32.vlgmr.msrb.gmra.mxu1 %v1042_v33  ;;  %v392_v33 = vpop.f32.mrf.mxu2 }
 0x5a4   :  { %756 = vmatpush.msra.mxu1 %v1486_v30  ;;  %v393_v51 = vadd.f32 %v392_v33, %v1419_v43  ;;  %v865_v33 = vld [vmem:[#allocation7 + $0x18] sm:$0xff] }
 0x5a6   :  { %757 = vmatpush.msra.mxu1 %v1493_v31 }
 0x5a8   :  { %758 = vmatpush.msra.mxu1 %v1498_v32 }
 0x5a9   :  { %v651_v10 = vpop.f32.mrf.mxu0 }
 0x5aa   :  { %759 = vmatpush.msra.mxu1 %v1513_v34  ;;  %v652_v11 = vadd.f32 %v651_v10, %v1603_v54 }
 0x5ab   :  { %v395_v35 = vpop.f32.mrf.mxu2 }
 0x5ac   :  { %760 = vmatpush.msra.mxu1 %v1517_v37  ;;  %v396_v62 = vadd.f32 %v395_v35, %v1419_v43 }
 0x5ae   :  { %761 = vmatpush.msra.mxu1 %v1522_v38 }
 0x5b0   :  { %762 = vmatpush.msra.mxu1 %v1525_v39 }
 0x5b1   :  { %v654_v15 = vpop.f32.mrf.mxu0 }
 0x5b2   :  { %763 = vmatpush.msra.mxu1 %v1535_v40  ;;  %v655_v16 = vadd.f32 %v654_v15, %v1603_v54 }
 0x5b3   :  { %v398_v61 = vpop.f32.mrf.mxu2 }
 0x5b4   :  { %764 = vmatpush.msra.mxu1 %v1541_v41  ;;  %v399_v7 = vadd.f32 %v398_v61, %v1419_v43 }
 0x5b6   :  { %765 = vmatpush.msra.mxu1 %v1543_v42 }
 0x5b8   :  { %766 = vmatpush.msra.mxu1 %v1549_v44 }
 0x5ba   :  { %767 = vmatpush.msra.mxu1 %v1559_v45 }
 0x5bc   :  { %840 = vmatpush.msrb.mxu1 %v1468_v26 }
 0x5be   :  { %841 = vmatpush.msrb.mxu1 %v1470_v27 }
 0x5c0   :  { %842 = vmatpush.msrb.mxu1 %v1474_v28 }
 0x5c2   :  { %843 = vmatpush.msrb.mxu1 %v1480_v29 }
 0x5c4   :  { %844 = vmatpush.msrb.mxu1 %v1486_v30 }
 0x5c6   :  { %845 = vmatpush.msrb.mxu1 %v1493_v31 }
 0x5c8   :  { %846 = vmatpush.msrb.mxu1 %v1498_v32 }
 0x5ca   :  { %847 = vmatpush.msrb.mxu1 %v1513_v34 }
 0x5cc   :  { %848 = vmatpush.msrb.mxu1 %v1517_v37 }
 0x5ce   :  { %849 = vmatpush.msrb.mxu1 %v1522_v38 }
 0x5d0   :  { %850 = vmatpush.msrb.mxu1 %v1525_v39 }
 0x5d2   :  { %851 = vmatpush.msrb.mxu1 %v1535_v40 }
 0x5d4   :  { %852 = vmatpush.msrb.mxu1 %v1541_v41 }
 0x5d6   :  { %853 = vmatpush.msrb.mxu1 %v1543_v42 }
 0x5d8   :  { %854 = vmatpush.msrb.mxu1 %v1549_v44 }
 0x5da   :  { %855 = vmatpush.msrb.mxu1 %v1559_v45 }
 0x618   :  { %v550_v52 = vpop.f32.mrf.mxu1  ;;  %v657_v19 = vpop.f32.mrf.mxu0 }
 0x619   :  { %v553_v53 = vadd.f32 %v550_v52, %v393_v51  ;;  %v658_v20 = vadd.f32 %v657_v19, %v1603_v54  ;;  %v864_v51 = vld [vmem:[#allocation7 + $0x10] sm:$0xff]  ;;  %v863_v52 = vld [vmem:[#allocation7 + $0x8] sm:$0xff] }
 0x61b   :  { %938 = vtanh.f32 %v553_v53  ;;  %v862_v53 = vld [vmem:[#allocation7] sm:$0xff] }
 0x620   :  { %v703_v57 = vpop.f32.mrf.mxu1 }
 0x621   :  { %v939_v58 = vpop.eup %938  ;;  %v706_v59 = vadd.f32 %v703_v57, %v646_v56 }
 0x622   :  { %572 = vmatmul.f32.vlgmr.msrb.gmra.mxu2 %v939_v58  ;;  %659 = vmatmul.f32.gmra.mxu0 %v939_v58 }
 0x623   :  { %940 = vtanh.f32 %v706_v59  ;;  %774 = vmatpush.msrb.mxu2 %v1468_v26  ;;  %v960_v59 = vld [vmem:[%s1656_s3] sm:$0xf] }
 0x625   :  { %775 = vmatpush.msrb.mxu2 %v1470_v27 }
 0x627   :  { %776 = vmatpush.msrb.mxu2 %v1474_v28 }
 0x629   :  { %v941_v60 = vpop.eup %940  ;;  %777 = vmatpush.msrb.mxu2 %v1480_v29 }
 0x62a   :  { %724 = vmatmul.f32.vlgmr.msra.gmra.mxu2 %v941_v60  ;;  %v878_v60 = vperm.slane %v960_v59, 3 }
 0x62b   :  { %778 = vmatpush.msrb.mxu2 %v1486_v30 }
 0x62d   :  { %779 = vmatpush.msrb.mxu2 %v1493_v31 }
 0x62f   :  { %780 = vmatpush.msrb.mxu2 %v1498_v32 }
 0x631   :  { %781 = vmatpush.msrb.mxu2 %v1513_v34 }
 0x633   :  { %782 = vmatpush.msrb.mxu2 %v1517_v37 }
 0x635   :  { %783 = vmatpush.msrb.mxu2 %v1522_v38 }
 0x637   :  { %784 = vmatpush.msrb.mxu2 %v1525_v39 }
 0x639   :  { %785 = vmatpush.msrb.mxu2 %v1535_v40 }
 0x63b   :  { %786 = vmatpush.msrb.mxu2 %v1541_v41 }
 0x63d   :  { %787 = vmatpush.msrb.mxu2 %v1543_v42 }
 0x63f   :  { %788 = vmatpush.msrb.mxu2 %v1549_v44 }
 0x641   :  { %789 = vmatpush.msrb.mxu2 %v1559_v45 }
 0x69f   :  { %v660_v24 = vpop.f32.mrf.mxu0 }
 0x6a0   :  { %v661_v25 = vadd.f32 %v660_v24, %v1603_v54 }
 0x6a5   :  { %v573_v63 = vpop.f32.mrf.mxu2 }
 0x6a6   :  { %v576_v0 = vadd.f32 %v573_v63, %v396_v62 }
 0x6a8   :  { %942 = vtanh.f32 %v576_v0 }
 0x6ad   :  { %v725_v3 = vpop.f32.mrf.mxu2 }
 0x6ae   :  { %v943_v4 = vpop.eup %942  ;;  %v728_v5 = vadd.f32 %v725_v3, %v649_v2 }
 0x6af   :  { %595 = vmatmul.f32.vlgmr.msra.gmra.mxu3 %v943_v4  ;;  %662 = vmatmul.f32.gmra.mxu0 %v943_v4 }
 0x6b0   :  { %944 = vtanh.f32 %v728_v5  ;;  %796 = vmatpush.msra.mxu3 %v1468_v26 }
 0x6b2   :  { %797 = vmatpush.msra.mxu3 %v1470_v27 }
 0x6b4   :  { %798 = vmatpush.msra.mxu3 %v1474_v28 }
 0x6b6   :  { %v945_v6 = vpop.eup %944  ;;  %799 = vmatpush.msra.mxu3 %v1480_v29  ;;  %v877_v29 = vld [vmem:[#allocation7 + $0x78] sm:$0xff] }
 0x6b7   :  { %746 = vmatmul.f32.vlgmr.msrb.gmra.mxu3 %v945_v6  ;;  %879 = vmatpush.msra.mxu2 %v877_v29 }
 0x6b8   :  { %800 = vmatpush.msra.mxu3 %v1486_v30  ;;  %v876_v30 = vld [vmem:[#allocation7 + $0x70] sm:$0xff] }
 0x6b9   :  { %880 = vmatpush.msra.mxu2 %v876_v30 }
 0x6ba   :  { %801 = vmatpush.msra.mxu3 %v1493_v31  ;;  %v875_v31 = vld [vmem:[#allocation7 + $0x68] sm:$0xff] }
 0x6bb   :  { %881 = vmatpush.msra.mxu2 %v875_v31 }
 0x6bc   :  { %802 = vmatpush.msra.mxu3 %v1498_v32  ;;  %v874_v32 = vld [vmem:[#allocation7 + $0x60] sm:$0xff] }
 0x6bd   :  { %882 = vmatpush.msra.mxu2 %v874_v32 }
 0x6be   :  { %803 = vmatpush.msra.mxu3 %v1513_v34 }
 0x6c0   :  { %804 = vmatpush.msra.mxu3 %v1517_v37  ;;  %v873_v37 = vld [vmem:[#allocation7 + $0x58] sm:$0xff] }
 0x6c1   :  { %883 = vmatpush.msra.mxu2 %v873_v37 }
 0x6c2   :  { %805 = vmatpush.msra.mxu3 %v1522_v38  ;;  %v872_v38 = vld [vmem:[#allocation7 + $0x50] sm:$0xff] }
 0x6c3   :  { %884 = vmatpush.msra.mxu2 %v872_v38 }
 0x6c4   :  { %806 = vmatpush.msra.mxu3 %v1525_v39  ;;  %v871_v39 = vld [vmem:[#allocation7 + $0x48] sm:$0xff] }
 0x6c5   :  { %885 = vmatpush.msra.mxu2 %v871_v39 }
 0x6c6   :  { %807 = vmatpush.msra.mxu3 %v1535_v40  ;;  %v870_v40 = vld [vmem:[#allocation7 + $0x40] sm:$0xff] }
 0x6c7   :  { %886 = vmatpush.msra.mxu2 %v870_v40 }
 0x6c8   :  { %808 = vmatpush.msra.mxu3 %v1541_v41 }
 0x6ca   :  { %809 = vmatpush.msra.mxu3 %v1543_v42  ;;  %v869_v42 = vld [vmem:[#allocation7 + $0x38] sm:$0xff] }
 0x6cb   :  { %887 = vmatpush.msra.mxu2 %v869_v42 }
 0x6cc   :  { %810 = vmatpush.msra.mxu3 %v1549_v44  ;;  %v868_v44 = vld [vmem:[#allocation7 + $0x30] sm:$0xff] }
 0x6cd   :  { %888 = vmatpush.msra.mxu2 %v868_v44 }
 0x6ce   :  { %811 = vmatpush.msra.mxu3 %v1559_v45  ;;  %v867_v45 = vld [vmem:[#allocation7 + $0x28] sm:$0xff] }
 0x6cf   :  { %889 = vmatpush.msra.mxu2 %v867_v45 }
 0x6d1   :  { %890 = vmatpush.msra.mxu2 %v866_v50 }
 0x6d3   :  { %891 = vmatpush.msra.mxu2 %v865_v33 }
 0x6d5   :  { %892 = vmatpush.msra.mxu2 %v864_v51 }
 0x6d7   :  { %893 = vmatpush.msra.mxu2 %v863_v52 }
 0x6d9   :  { %894 = vmatpush.msra.mxu2 %v862_v53 }
 0x72c   :  { %v663_v34 = vpop.f32.mrf.mxu0 }
 0x72d   :  { %v664_v46 = vadd.f32 %v663_v34, %v1603_v54 }
 0x732   :  { %v596_v8 = vpop.f32.mrf.mxu3 }
 0x733   :  { %v599_v9 = vadd.f32 %v596_v8, %v399_v7 }
 0x735   :  { %946 = vtanh.f32 %v599_v9 }
 0x73a   :  { %v747_v36 = vpop.f32.mrf.mxu3 }
 0x73b   :  { %v947_v12 = vpop.eup %946  ;;  %v750_v13 = vadd.f32 %v747_v36, %v652_v11 }
 0x73c   :  { %665 = vmatmul.f32.gmra.mxu0 %v947_v12 }
 0x73d   :  { %948 = vtanh.f32 %v750_v13 }
 0x743   :  { %v949_v14 = vpop.eup %948 }
 0x744   :  { %768 = vmatmul.f32.vlgmr.msra.gmra.mxu1 %v949_v14 }
 0x7b9   :  { %v666_v41 = vpop.f32.mrf.mxu0 }
 0x7ba   :  { %v667_v55 = vadd.f32 %v666_v41, %v1603_v54 }
 0x7c1   :  { %v769_v17 = vpop.f32.mrf.mxu1 }
 0x7c2   :  { %v772_v18 = vadd.f32 %v769_v17, %v655_v16 }
 0x7c4   :  { %950 = vtanh.f32 %v772_v18 }
 0x7ca   :  { %v951_v43 = vpop.eup %950 }
 0x7cb   :  { %790 = vmatmul.f32.vlgmr.msrb.gmra.mxu2 %v951_v43 }
 0x84e   :  { %v791_v21 = vpop.f32.mrf.mxu2 }
 0x84f   :  { %v794_v22 = vadd.f32 %v791_v21, %v658_v20 }
 0x851   :  { %952 = vtanh.f32 %v794_v22 }
 0x857   :  { %v953_v23 = vpop.eup %952 }
 0x858   :  { %812 = vmatmul.f32.vlgmr.msra.gmra.mxu3 %v953_v23 }
 0x8db   :  { %v813_v26 = vpop.f32.mrf.mxu3 }
 0x8dc   :  { %v816_v27 = vadd.f32 %v813_v26, %v661_v25 }
 0x8de   :  { %954 = vtanh.f32 %v816_v27 }
 0x8e4   :  { %v955_v28 = vpop.eup %954 }
 0x8e5   :  { %834 = vmatmul.f32.vlgmr.msrb.gmra.mxu0 %v955_v28 }
 0x962   :  { %v835_v47 = vpop.f32.mrf.mxu0 }
 0x963   :  { %v838_v48 = vadd.f32 %v835_v47, %v664_v46 }
 0x965   :  { %956 = vtanh.f32 %v838_v48 }
 0x96b   :  { %v957_v49 = vpop.eup %956 }
 0x96c   :  { %856 = vmatmul.f32.vlgmr.msrb.gmra.mxu1 %v957_v49 }
 0x9e9   :  { %v857_v56 = vpop.f32.mrf.mxu1 }
 0x9ea   :  { %v860_v57 = vadd.f32 %v857_v56, %v667_v55 }
 0x9ec   :  { %958 = vtanh.f32 %v860_v57 }
 0x9f2   :  { %v959_v58 = vpop.eup %958 }
 0x9f3   :  { %895 = vmatmul.f32.vlgmr.msra.gmra.mxu2 %v959_v58 }
 0xa76   :  { %v896_v35 = vpop.f32.mrf.mxu2 }
 0xa77   :  { %v897_v61 = vadd.f32 %v896_v35, %v878_v60 }
 0xa79   :  { %899 = vst [vmem:[%s1658_s5] sm:$0xff] %v897_v61 }
 0xa7a   :  { %904 = vsyncpa [#allocation4], 1 }
 0xa7b   :  { %905 = vsyncpa [#allocation6], 1 }

</bundles_post_ra>
